<compile_context>
chip_gen: v5e
topology: v5e:2x2
jax: 0.10.0
libtpu: 0.0.40
codegen_flags: <defaults>
</compile_context>

<pallas_src>
import functools

import jax
import jax.numpy as jnp
from jax import lax
from jax.experimental import pallas as pl
from jax.experimental.pallas import tpu as pltpu


def _layernorm(x, gamma, beta, eps=1e-5):
    # x: (T, D); gamma/beta: (1, D).  Matches torch.nn.LayerNorm (biased variance).
    mean = jnp.mean(x, axis=-1, keepdims=True)
    xc = x - mean
    var = jnp.mean(xc * xc, axis=-1, keepdims=True)
    inv = lax.rsqrt(var + eps)
    return xc * inv * gamma + beta


def encoder_layer_kernel(
    x_ref,
    wq_ref, bq_ref, wk_ref, bk_ref, wv_ref, bv_ref, wo_ref, bo_ref,
    g1_ref, be1_ref,
    w1_ref, bf1_ref, w2_ref, bf2_ref,
    g2_ref, be2_ref,
    o_ref,
    k_sc, v_sc,
    *, num_heads, heads_per_group, tile_s,
):
    s_idx = pl.program_id(1)
    S = x_ref.shape[1]
    D = x_ref.shape[2]
    dk = D // num_heads
    gw = heads_per_group * dk
    n_groups = num_heads // heads_per_group
    n_ff = w1_ref.shape[0]
    scale = 1.0 / float(dk) ** 0.5

    # ---- K / V for the whole sequence: computed once per batch element ------
    @pl.when(s_idx == 0)
    def _():
        xb = x_ref[0].astype(jnp.bfloat16)                              # (S, D)

        def kv_body(g, carry):
            k_sc[g] = (jnp.dot(xb, wk_ref[g], preferred_element_type=jnp.float32)
                       + bk_ref[g]).astype(jnp.bfloat16)
            v_sc[g] = (jnp.dot(xb, wv_ref[g], preferred_element_type=jnp.float32)
                       + bv_ref[g]).astype(jnp.bfloat16)
            return carry

        lax.fori_loop(0, n_groups, kv_body, 0, unroll=True)

    # ---- Q / attention for this row tile, one lane-dense head-group at a time
    row0 = pl.multiple_of(s_idx * tile_s, tile_s)
    x_tile = x_ref[0, pl.ds(row0, tile_s), :]                            # (tile_s, D) f32
    x_bf = x_tile.astype(jnp.bfloat16)

    nt_dims = (((1,), (1,)), ((), ()))   # contract last dims: q @ k^T without a transpose

    def group_body(g, attn_acc):
        q_g = (jnp.dot(x_bf, wq_ref[g], preferred_element_type=jnp.float32)
               + bq_ref[g]).astype(jnp.bfloat16)                         # (tile_s, gw)
        k_g = k_sc[g]                                                    # (S, gw) bf16
        v_g = v_sc[g]                                                    # (S, gw) bf16
        parts = []
        for hh in range(heads_per_group):
            sl = slice(hh * dk, (hh + 1) * dk)
            sc = lax.dot_general(q_g[:, sl], k_g[:, sl], nt_dims,
                                 preferred_element_type=jnp.float32) * scale
            sc = sc - jnp.max(sc, axis=-1, keepdims=True)
            p = jnp.exp(sc)
            p = p * pl.reciprocal(jnp.sum(p, axis=-1, keepdims=True), approx=False)
            parts.append(jnp.dot(p.astype(jnp.bfloat16), v_g[:, sl],
                                 preferred_element_type=jnp.float32))    # (tile_s, dk)
        ctx_g = parts[0] if heads_per_group == 1 else jnp.concatenate(parts, axis=-1)
        # Fold this group's rows of W_o immediately (no per-head masked stores,
        # no (tile_s, D) context scratch).
        return attn_acc + jnp.dot(ctx_g.astype(jnp.bfloat16), wo_ref[g],
                                  preferred_element_type=jnp.float32)

    attn = lax.fori_loop(0, n_groups, group_body,
                         jnp.zeros((tile_s, D), jnp.float32), unroll=True)
    attn = attn + bo_ref[...]

    # ---- residual + LayerNorm 1 ----------------------------------------------
    x1 = _layernorm(x_tile + attn, g1_ref[...], be1_ref[...])            # f32
    x1_bf = x1.astype(jnp.bfloat16)

    # ---- Feed-forward, chunked over d_ff (leading-axis indexed weight chunks)
    def ffn_body(c, acc):
        h1 = (jnp.dot(x1_bf, w1_ref[c], preferred_element_type=jnp.float32)
              + bf1_ref[c])
        h1 = jnp.maximum(h1, 0.0).astype(jnp.bfloat16)
        return acc + jnp.dot(h1, w2_ref[c], preferred_element_type=jnp.float32)

    ff = lax.fori_loop(0, n_ff, ffn_body,
                       jnp.zeros((tile_s, D), jnp.float32), unroll=True)
    ff = ff + bf2_ref[...]

    # ---- residual + LayerNorm 2 ----------------------------------------------
    o_ref[0] = _layernorm(x1 + ff, g2_ref[...], be2_ref[...])


def _largest_factor(n, multiple, cap):
    # Largest divisor of n that is a multiple of `multiple` and <= cap (None if none).
    best = None
    t = multiple
    while t <= min(cap, n):
        if n % t == 0:
            best = t
        t += multiple
    return best


def _pick_heads_per_group(num_heads, dk):
    # Smallest divisor g of num_heads with g*dk a multiple of 128 (lane-dense group);
    # otherwise all heads in one group.
    for g in range(1, num_heads + 1):
        if num_heads % g == 0 and (g * dk) % 128 == 0:
            return g
    return num_heads


def encoder_layer(x, params, num_heads):
    B, S, D = x.shape
    d_ff = params["w1"].shape[1]
    assert D % num_heads == 0, "d_model must be divisible by num_heads"
    dk = D // num_heads

    # ---- Generation-aware VMEM capacity (v7x: 64 MiB/TC, v5e/v6e: 128 MiB) ----
    vmem_cap = 128 * 2**20
    try:
        cap = getattr(pltpu.get_tpu_info(), "vmem_capacity_bytes", None)
        if cap:
            vmem_cap = int(cap)
    except Exception:
        pass

    # ---- Tiling decisions ------------------------------------------------------
    max_tile = 256 if vmem_cap >= 96 * 2**20 else 128
    tile_s = _largest_factor(S, 8, max_tile) or S
    n_s = S // tile_s

    ffn_chunk = _largest_factor(d_ff, 128, 512) or d_ff
    n_ff = d_ff // ffn_chunk

    heads_per_group = _pick_heads_per_group(num_heads, dk)
    gw = heads_per_group * dk
    n_groups = num_heads // heads_per_group

    f32, bf16 = jnp.float32, jnp.bfloat16

    # ---- Host-side layout plumbing: chunk weights along their looped axis so the
    # kernel only dynamically indexes a leading (major) dimension. -----------------
    def chunk_cols(w, n, c):     # (I, O) -> (n, I, c), O = n*c (column chunks)
        return jnp.transpose(w.reshape(w.shape[0], n, c), (1, 0, 2))

    def chunk_bias(b, n, c):     # (1, O) -> (n, 1, c)
        return b.reshape(n, c)[:, None, :]

    wq = chunk_cols(params["wq"].astype(bf16), n_groups, gw)
    wk = chunk_cols(params["wk"].astype(bf16), n_groups, gw)
    wv = chunk_cols(params["wv"].astype(bf16), n_groups, gw)
    wo = params["wo"].astype(bf16).reshape(n_groups, gw, D)        # row chunks
    bq = chunk_bias(params["bq"].astype(f32), n_groups, gw)
    bk = chunk_bias(params["bk"].astype(f32), n_groups, gw)
    bv = chunk_bias(params["bv"].astype(f32), n_groups, gw)
    bo = params["bo"].astype(f32)

    w1 = chunk_cols(params["w1"].astype(bf16), n_ff, ffn_chunk)
    bf1 = chunk_bias(params["bf1"].astype(f32), n_ff, ffn_chunk)
    w2 = params["w2"].astype(bf16).reshape(n_ff, ffn_chunk, D)     # row chunks
    bf2 = params["bf2"].astype(f32)

    g1, be1 = params["g1"].astype(f32), params["be1"].astype(f32)
    g2, be2 = params["g2"].astype(f32), params["be2"].astype(f32)

    weights = (wq, bq, wk, bk, wv, bv, wo, bo, g1, be1, w1, bf1, w2, bf2, g2, be2)

    # ---- VMEM budget / cost estimate -------------------------------------------
    weight_bytes = sum(int(w.size) * w.dtype.itemsize for w in weights)
    x_out_bytes = 2 * S * D * 4 + 2 * tile_s * D * 4          # double-buffered blocks
    kv_bytes = 2 * S * D * 2                                   # bf16 K/V scratch
    act_bytes = 4 * tile_s * S * 4 + 6 * tile_s * max(D, ffn_chunk, gw) * 4
    est = 2 * weight_bytes + x_out_bytes + kv_bytes + act_bytes
    vmem_limit = int(min(int(0.9 * vmem_cap), max(32 * 2**20, int(1.5 * est))))

    cost = pl.CostEstimate(
        flops=int(B * (8 * S * D * D + 4 * S * S * D + 4 * S * D * d_ff)),
        transcendentals=int(B * num_heads * S * S),
        bytes_accessed=int(2 * B * S * D * 4 + weight_bytes),
    )

    kernel = functools.partial(
        encoder_layer_kernel, num_heads=num_heads,
        heads_per_group=heads_per_group, tile_s=tile_s)

    def build_call(single_buffer):
        def const_spec(shape):
            # Constant-index, fully-resident parameter block.
            if len(shape) == 3:
                idx = lambda b, s: (0, 0, 0)
            else:
                idx = lambda b, s: (0, 0)
            if single_buffer:
                return pl.BlockSpec(shape, idx, pipeline_mode=pl.Buffered(1))
            return pl.BlockSpec(shape, idx)

        in_specs = [pl.BlockSpec((1, S, D), lambda b, s: (b, 0, 0))]   # x: full seq per batch
        in_specs += [const_spec(w.shape) for w in weights]
        out_spec = pl.BlockSpec((1, tile_s, D), lambda b, s: (b, s, 0))

        return pl.pallas_call(
            kernel,
            out_shape=jax.ShapeDtypeStruct((B, S, D), jnp.float32),
            grid_spec=pltpu.PrefetchScalarGridSpec(
                num_scalar_prefetch=0,
                grid=(B, n_s),
                in_specs=in_specs,
                out_specs=out_spec,
                scratch_shapes=[
                    pltpu.VMEM((n_groups, S, gw), bf16),   # K (full sequence, per group)
                    pltpu.VMEM((n_groups, S, gw), bf16),   # V (full sequence, per group)
                ],
            ),
            compiler_params=pltpu.CompilerParams(
                dimension_semantics=("parallel", "arbitrary"),
                vmem_limit_bytes=vmem_limit,
            ),
            cost_estimate=cost,
        )

    args = (x,) + weights
    single_buffer = hasattr(pl, "Buffered")
    try:
        return build_call(single_buffer)(*args)
    except Exception:
        if not single_buffer:
            raise
        # Fallback for JAX versions that reject pipeline_mode / Buffered(1).
        return build_call(False)(*args)


def make_params(key, d_model, d_ff):
    # Deterministic synthetic parameters.  Linear weights stored pre-transposed as
    # (in_features, out_features) in bf16 (matmul operands); biases / LayerNorm
    # affine params stay f32.  Biases are kept 2D: (1, out).
    ks = jax.random.split(key, 12)
    s = 0.1
    w = lambda k, shape: (s * jax.random.normal(k, shape, jnp.float32)).astype(jnp.bfloat16)
    b = lambda k, shape: s * jax.random.normal(k, shape, jnp.float32)
    return {
        "wq": w(ks[0], (d_model, d_model)), "bq": b(ks[1], (1, d_model)),
        "wk": w(ks[2], (d_model, d_model)), "bk": b(ks[3], (1, d_model)),
        "wv": w(ks[4], (d_model, d_model)), "bv": b(ks[5], (1, d_model)),
        "wo": w(ks[6], (d_model, d_model)), "bo": b(ks[7], (1, d_model)),
        "w1": w(ks[8], (d_model, d_ff)),    "bf1": b(ks[9], (1, d_ff)),
        "w2": w(ks[10], (d_ff, d_model)),   "bf2": b(ks[11], (1, d_model)),
        "g1": jnp.ones((1, d_model), jnp.float32),
        "be1": jnp.zeros((1, d_model), jnp.float32),
        "g2": jnp.ones((1, d_model), jnp.float32),
        "be2": jnp.zeros((1, d_model), jnp.float32),
    }


def encoder_layer_ref(x, params, num_heads):
    # Pure-JAX f32 reference mirroring the PyTorch forward (eval mode), using the
    # same (bf16-rounded) weights upcast to f32.
    p = {k: v.astype(jnp.float32) for k, v in params.items()}
    B, S, D = x.shape
    dk = D // num_heads

    def lin(v, w, b):
        return v @ w + b

    q = lin(x, p["wq"], p["bq"]).reshape(B, S, num_heads, dk).transpose(0, 2, 1, 3)
    k = lin(x, p["wk"], p["bk"]).reshape(B, S, num_heads, dk).transpose(0, 2, 1, 3)
    v = lin(x, p["wv"], p["bv"]).reshape(B, S, num_heads, dk).transpose(0, 2, 1, 3)
    scores = jnp.einsum("bhqd,bhkd->bhqk", q, k) / jnp.sqrt(jnp.float32(dk))
    w_ = jax.nn.softmax(scores, axis=-1)
    ctx = jnp.einsum("bhqk,bhkd->bhqd", w_, v).transpose(0, 2, 1, 3).reshape(B, S, D)
    attn = lin(ctx, p["wo"], p["bo"])

    def ln(v_, g, b, eps=1e-5):
        m = jnp.mean(v_, -1, keepdims=True)
        var = jnp.mean((v_ - m) ** 2, -1, keepdims=True)
        return (v_ - m) / jnp.sqrt(var + eps) * g + b

    x1 = ln(x + attn, p["g1"], p["be1"])
    ff = lin(jnp.maximum(lin(x1, p["w1"], p["bf1"]), 0.0), p["w2"], p["bf2"])
    return ln(x1 + ff, p["g2"], p["be2"])


if __name__ == "__main__":
    B, S, d_model, num_heads, d_ff = 2, 8, 32, 4, 64
    key = jax.random.PRNGKey(0)
    kx, kp = jax.random.split(key)
    x = jax.random.normal(kx, (B, S, d_model), jnp.float32)
    params = make_params(kp, d_model, d_ff)

    out = jax.block_until_ready(encoder_layer(x, params, num_heads))
    ref = encoder_layer_ref(x, params, num_heads)

    assert out.shape == (B, S, d_model)
    # bf16 matmul operands => ~1e-2-level differences vs f32 reference.
    max_err = float(jnp.max(jnp.abs(out - ref)))
    assert jnp.allclose(out, ref, atol=5e-2, rtol=5e-2), f"mismatch vs. reference (max abs err {max_err})"

    print("KERNEL_OK")
</pallas_src>

<mosaic_0001>
module attributes {stable_mosaic.version = 11 : i64} {
  func.func @encoder_layer_kernel(%arg0: i32, %arg1: i32, %arg2: memref<1x8x32xf32, #tpu.memory_space<vmem>>, %arg3: memref<1x32x32xbf16, #tpu.memory_space<vmem>>, %arg4: memref<1x1x32xf32, #tpu.memory_space<vmem>>, %arg5: memref<1x32x32xbf16, #tpu.memory_space<vmem>>, %arg6: memref<1x1x32xf32, #tpu.memory_space<vmem>>, %arg7: memref<1x32x32xbf16, #tpu.memory_space<vmem>>, %arg8: memref<1x1x32xf32, #tpu.memory_space<vmem>>, %arg9: memref<1x32x32xbf16, #tpu.memory_space<vmem>>, %arg10: memref<1x32xf32, #tpu.memory_space<vmem>>, %arg11: memref<1x32xf32, #tpu.memory_space<vmem>>, %arg12: memref<1x32xf32, #tpu.memory_space<vmem>>, %arg13: memref<1x32x64xbf16, #tpu.memory_space<vmem>>, %arg14: memref<1x1x64xf32, #tpu.memory_space<vmem>>, %arg15: memref<1x64x32xbf16, #tpu.memory_space<vmem>>, %arg16: memref<1x32xf32, #tpu.memory_space<vmem>>, %arg17: memref<1x32xf32, #tpu.memory_space<vmem>>, %arg18: memref<1x32xf32, #tpu.memory_space<vmem>>, %arg19: memref<1x8x32xf32, #tpu.memory_space<vmem>>, %arg20: memref<1x8x32xbf16, #tpu.memory_space<vmem>>, %arg21: memref<1x8x32xbf16, #tpu.memory_space<vmem>>) attributes {dimension_semantics = [#tpu.dimension_semantics<parallel>, #tpu.dimension_semantics<arbitrary>], iteration_bounds = array<i64: 2, 1>, scalar_prefetch = 0 : i64, scratch_operands = 2 : i64, tpu.core_type = #tpu.core_type<tc>, window_params = [{transform_indices = @transform_0, window_bounds = array<i64: 1, 8, 32>}, {pipeline_mode = #tpu.pipeline_mode<synchronous>, transform_indices = @transform_1, window_bounds = array<i64: 1, 32, 32>}, {pipeline_mode = #tpu.pipeline_mode<synchronous>, transform_indices = @transform_2, window_bounds = array<i64: 1, 1, 32>}, {pipeline_mode = #tpu.pipeline_mode<synchronous>, transform_indices = @transform_3, window_bounds = array<i64: 1, 32, 32>}, {pipeline_mode = #tpu.pipeline_mode<synchronous>, transform_indices = @transform_4, window_bounds = array<i64: 1, 1, 32>}, {pipeline_mode = #tpu.pipeline_mode<synchronous>, transform_indices = @transform_5, window_bounds = array<i64: 1, 32, 32>}, {pipeline_mode = #tpu.pipeline_mode<synchronous>, transform_indices = @transform_6, window_bounds = array<i64: 1, 1, 32>}, {pipeline_mode = #tpu.pipeline_mode<synchronous>, transform_indices = @transform_7, window_bounds = array<i64: 1, 32, 32>}, {pipeline_mode = #tpu.pipeline_mode<synchronous>, transform_indices = @transform_8, window_bounds = array<i64: 1, 32>}, {pipeline_mode = #tpu.pipeline_mode<synchronous>, transform_indices = @transform_9, window_bounds = array<i64: 1, 32>}, {pipeline_mode = #tpu.pipeline_mode<synchronous>, transform_indices = @transform_10, window_bounds = array<i64: 1, 32>}, {pipeline_mode = #tpu.pipeline_mode<synchronous>, transform_indices = @transform_11, window_bounds = array<i64: 1, 32, 64>}, {pipeline_mode = #tpu.pipeline_mode<synchronous>, transform_indices = @transform_12, window_bounds = array<i64: 1, 1, 64>}, {pipeline_mode = #tpu.pipeline_mode<synchronous>, transform_indices = @transform_13, window_bounds = array<i64: 1, 64, 32>}, {pipeline_mode = #tpu.pipeline_mode<synchronous>, transform_indices = @transform_14, window_bounds = array<i64: 1, 32>}, {pipeline_mode = #tpu.pipeline_mode<synchronous>, transform_indices = @transform_15, window_bounds = array<i64: 1, 32>}, {pipeline_mode = #tpu.pipeline_mode<synchronous>, transform_indices = @transform_16, window_bounds = array<i64: 1, 32>}, {transform_indices = @transform_17, window_bounds = array<i64: 1, 8, 32>}]} {
    %c0_i32 = arith.constant 0 : i32
    %0 = arith.cmpi eq, %arg1, %c0_i32 : i32
    %1 = arith.extui %0 : i1 to i32
    %c0_i32_0 = arith.constant 0 : i32
    %2 = arith.cmpi ne, %1, %c0_i32_0 : i32
    scf.if %2 {
      %c0_72 = arith.constant 0 : index
      %c0_73 = arith.constant 0 : index
      %c0_74 = arith.constant 0 : index
      %179 = vector.load %arg2[%c0_72, %c0_73, %c0_74] : memref<1x8x32xf32, #tpu.memory_space<vmem>>, vector<1x8x32xf32>
      %180 = vector.shape_cast %179 : vector<1x8x32xf32> to vector<8x32xf32>
      %181 = arith.truncf %180 : vector<8x32xf32> to vector<8x32xbf16>
      %c0_i32_75 = arith.constant 0 : i32
      %182 = arith.index_cast %c0_i32_75 : i32 to index
      %c0_76 = arith.constant 0 : index
      %c0_77 = arith.constant 0 : index
      %183 = vector.load %arg5[%182, %c0_76, %c0_77] : memref<1x32x32xbf16, #tpu.memory_space<vmem>>, vector<1x32x32xbf16>
      %184 = vector.shape_cast %183 : vector<1x32x32xbf16> to vector<32x32xbf16>
      %cst_78 = arith.constant dense<0.000000e+00> : vector<8x32xf32>
      %185 = tpu.matmul %181, %184, %cst_78 {dimension_numbers = #tpu.dot_dimension_numbers<[1], [0], [0], [1], [0, 0, 1, 1], [], []>} : vector<8x32xbf16>, vector<32x32xbf16>, vector<8x32xf32> -> vector<8x32xf32>
      %186 = arith.index_cast %c0_i32_75 : i32 to index
      %c0_79 = arith.constant 0 : index
      %c0_80 = arith.constant 0 : index
      %187 = vector.load %arg6[%186, %c0_79, %c0_80] : memref<1x1x32xf32, #tpu.memory_space<vmem>>, vector<1x1x32xf32>
      %188 = vector.shape_cast %187 : vector<1x1x32xf32> to vector<1x32xf32>
      %189 = vector.broadcast %188 : vector<1x32xf32> to vector<8x32xf32>
      %190 = arith.addf %185, %189 : vector<8x32xf32>
      %191 = arith.truncf %190 : vector<8x32xf32> to vector<8x32xbf16>
      %192 = arith.index_cast %c0_i32_75 : i32 to index
      %c0_81 = arith.constant 0 : index
      %c0_82 = arith.constant 0 : index
      %193 = vector.load %arg20[%192, %c0_81, %c0_82] : memref<1x8x32xbf16, #tpu.memory_space<vmem>>, vector<1x8x32xbf16>
      %194 = vector.shape_cast %193 : vector<1x8x32xbf16> to vector<8x32xbf16>
      %195 = vector.shape_cast %191 : vector<8x32xbf16> to vector<1x8x32xbf16>
      tpu.vector_store %arg20[%192, %c0_81, %c0_82], %195 {strides = array<i32>} : memref<1x8x32xbf16, #tpu.memory_space<vmem>>, vector<1x8x32xbf16>,
      %196 = arith.index_cast %c0_i32_75 : i32 to index
      %c0_83 = arith.constant 0 : index
      %c0_84 = arith.constant 0 : index
      %197 = vector.load %arg7[%196, %c0_83, %c0_84] : memref<1x32x32xbf16, #tpu.memory_space<vmem>>, vector<1x32x32xbf16>
      %198 = vector.shape_cast %197 : vector<1x32x32xbf16> to vector<32x32xbf16>
      %cst_85 = arith.constant dense<0.000000e+00> : vector<8x32xf32>
      %199 = tpu.matmul %181, %198, %cst_85 {dimension_numbers = #tpu.dot_dimension_numbers<[1], [0], [0], [1], [0, 0, 1, 1], [], []>} : vector<8x32xbf16>, vector<32x32xbf16>, vector<8x32xf32> -> vector<8x32xf32>
      %200 = arith.index_cast %c0_i32_75 : i32 to index
      %c0_86 = arith.constant 0 : index
      %c0_87 = arith.constant 0 : index
      %201 = vector.load %arg8[%200, %c0_86, %c0_87] : memref<1x1x32xf32, #tpu.memory_space<vmem>>, vector<1x1x32xf32>
      %202 = vector.shape_cast %201 : vector<1x1x32xf32> to vector<1x32xf32>
      %203 = vector.broadcast %202 : vector<1x32xf32> to vector<8x32xf32>
      %204 = arith.addf %199, %203 : vector<8x32xf32>
      %205 = arith.truncf %204 : vector<8x32xf32> to vector<8x32xbf16>
      %206 = arith.index_cast %c0_i32_75 : i32 to index
      %c0_88 = arith.constant 0 : index
      %c0_89 = arith.constant 0 : index
      %207 = vector.load %arg21[%206, %c0_88, %c0_89] : memref<1x8x32xbf16, #tpu.memory_space<vmem>>, vector<1x8x32xbf16>
      %208 = vector.shape_cast %207 : vector<1x8x32xbf16> to vector<8x32xbf16>
      %209 = vector.shape_cast %205 : vector<8x32xbf16> to vector<1x8x32xbf16>
      tpu.vector_store %arg21[%206, %c0_88, %c0_89], %209 {strides = array<i32>} : memref<1x8x32xbf16, #tpu.memory_space<vmem>>, vector<1x8x32xbf16>,
      %c1_i32_90 = arith.constant 1 : i32
    } else {
    }
    %c8_i32 = arith.constant 8 : i32
    %3 = arith.muli %arg1, %c8_i32 : i32
    %4 = tpu.assume_multiple %3, 8 : i32
    %c0 = arith.constant 0 : index
    %5 = arith.index_cast %4 : i32 to index
    %c0_1 = arith.constant 0 : index
    %6 = vector.load %arg2[%c0, %5, %c0_1] : memref<1x8x32xf32, #tpu.memory_space<vmem>>, vector<1x8x32xf32>
    %7 = vector.shape_cast %6 : vector<1x8x32xf32> to vector<8x32xf32>
    %8 = arith.truncf %7 : vector<8x32xf32> to vector<8x32xbf16>
    %cst = arith.constant 0.000000e+00 : f32
    %9 = vector.broadcast %cst : f32 to vector<8x32xf32>
    %c0_i32_2 = arith.constant 0 : i32
    %10 = arith.index_cast %c0_i32_2 : i32 to index
    %c0_3 = arith.constant 0 : index
    %c0_4 = arith.constant 0 : index
    %11 = vector.load %arg3[%10, %c0_3, %c0_4] : memref<1x32x32xbf16, #tpu.memory_space<vmem>>, vector<1x32x32xbf16>
    %12 = vector.shape_cast %11 : vector<1x32x32xbf16> to vector<32x32xbf16>
    %cst_5 = arith.constant dense<0.000000e+00> : vector<8x32xf32>
    %13 = tpu.matmul %8, %12, %cst_5 {dimension_numbers = #tpu.dot_dimension_numbers<[1], [0], [0], [1], [0, 0, 1, 1], [], []>} : vector<8x32xbf16>, vector<32x32xbf16>, vector<8x32xf32> -> vector<8x32xf32>
    %14 = arith.index_cast %c0_i32_2 : i32 to index
    %c0_6 = arith.constant 0 : index
    %c0_7 = arith.constant 0 : index
    %15 = vector.load %arg4[%14, %c0_6, %c0_7] : memref<1x1x32xf32, #tpu.memory_space<vmem>>, vector<1x1x32xf32>
    %16 = vector.shape_cast %15 : vector<1x1x32xf32> to vector<1x32xf32>
    %17 = vector.broadcast %16 : vector<1x32xf32> to vector<8x32xf32>
    %18 = arith.addf %13, %17 : vector<8x32xf32>
    %19 = arith.truncf %18 : vector<8x32xf32> to vector<8x32xbf16>
    %20 = arith.index_cast %c0_i32_2 : i32 to index
    %c0_8 = arith.constant 0 : index
    %c0_9 = arith.constant 0 : index
    %21 = vector.load %arg20[%20, %c0_8, %c0_9] : memref<1x8x32xbf16, #tpu.memory_space<vmem>>, vector<1x8x32xbf16>
    %22 = vector.shape_cast %21 : vector<1x8x32xbf16> to vector<8x32xbf16>
    %23 = arith.index_cast %c0_i32_2 : i32 to index
    %c0_10 = arith.constant 0 : index
    %c0_11 = arith.constant 0 : index
    %24 = vector.load %arg21[%23, %c0_10, %c0_11] : memref<1x8x32xbf16, #tpu.memory_space<vmem>>, vector<1x8x32xbf16>
    %25 = vector.shape_cast %24 : vector<1x8x32xbf16> to vector<8x32xbf16>
    %26 = vector.extract_strided_slice %19 {offsets = [0, 0], sizes = [8, 8], strides = [1, 1]} : vector<8x32xbf16> to vector<8x8xbf16>
    %27 = vector.extract_strided_slice %22 {offsets = [0, 0], sizes = [8, 8], strides = [1, 1]} : vector<8x32xbf16> to vector<8x8xbf16>
    %cst_12 = arith.constant dense<0.000000e+00> : vector<8x8xf32>
    %28 = tpu.matmul %26, %27, %cst_12 {dimension_numbers = #tpu.dot_dimension_numbers<[1], [1], [0], [0], [0, 0, 1, 0], [], []>} : vector<8x8xbf16>, vector<8x8xbf16>, vector<8x8xf32> -> vector<8x8xf32>
    %cst_13 = arith.constant 0.353553385 : f32
    %29 = vector.broadcast %cst_13 : f32 to vector<8x8xf32>
    %30 = arith.mulf %28, %29 : vector<8x8xf32>
    %cst_14 = arith.constant dense<0xFF800000> : vector<8xf32>
    %31 = vector.multi_reduction <maximumf>, %30, %cst_14 [1] : vector<8x8xf32> to vector<8xf32>
    %32 = vector.shape_cast %31 : vector<8xf32> to vector<8x1xf32>
    %33 = vector.broadcast %32 : vector<8x1xf32> to vector<8x8xf32>
    %34 = arith.subf %30, %33 : vector<8x8xf32>
    %35 = math.exp %34 : vector<8x8xf32>
    %cst_15 = arith.constant dense<0.000000e+00> : vector<8xf32>
    %36 = vector.multi_reduction <add>, %35, %cst_15 [1] : vector<8x8xf32> to vector<8xf32>
    %37 = vector.shape_cast %36 : vector<8xf32> to vector<8x1xf32>
    %38 = tpu.reciprocal %37 : vector<8x1xf32> -> vector<8x1xf32>
    %39 = vector.broadcast %38 : vector<8x1xf32> to vector<8x8xf32>
    %40 = arith.mulf %35, %39 : vector<8x8xf32>
    %41 = arith.truncf %40 : vector<8x8xf32> to vector<8x8xbf16>
    %42 = vector.extract_strided_slice %25 {offsets = [0, 0], sizes = [8, 8], strides = [1, 1]} : vector<8x32xbf16> to vector<8x8xbf16>
    %cst_16 = arith.constant dense<0.000000e+00> : vector<8x8xf32>
    %43 = tpu.matmul %41, %42, %cst_16 {dimension_numbers = #tpu.dot_dimension_numbers<[1], [0], [0], [1], [0, 0, 1, 1], [], []>} : vector<8x8xbf16>, vector<8x8xbf16>, vector<8x8xf32> -> vector<8x8xf32>
    %44 = vector.extract_strided_slice %19 {offsets = [0, 8], sizes = [8, 8], strides = [1, 1]} : vector<8x32xbf16> to vector<8x8xbf16>
    %45 = vector.extract_strided_slice %22 {offsets = [0, 8], sizes = [8, 8], strides = [1, 1]} : vector<8x32xbf16> to vector<8x8xbf16>
    %cst_17 = arith.constant dense<0.000000e+00> : vector<8x8xf32>
    %46 = tpu.matmul %44, %45, %cst_17 {dimension_numbers = #tpu.dot_dimension_numbers<[1], [1], [0], [0], [0, 0, 1, 0], [], []>} : vector<8x8xbf16>, vector<8x8xbf16>, vector<8x8xf32> -> vector<8x8xf32>
    %cst_18 = arith.constant 0.353553385 : f32
    %47 = vector.broadcast %cst_18 : f32 to vector<8x8xf32>
    %48 = arith.mulf %46, %47 : vector<8x8xf32>
    %cst_19 = arith.constant dense<0xFF800000> : vector<8xf32>
    %49 = vector.multi_reduction <maximumf>, %48, %cst_19 [1] : vector<8x8xf32> to vector<8xf32>
    %50 = vector.shape_cast %49 : vector<8xf32> to vector<8x1xf32>
    %51 = vector.broadcast %50 : vector<8x1xf32> to vector<8x8xf32>
    %52 = arith.subf %48, %51 : vector<8x8xf32>
    %53 = math.exp %52 : vector<8x8xf32>
    %cst_20 = arith.constant dense<0.000000e+00> : vector<8xf32>
    %54 = vector.multi_reduction <add>, %53, %cst_20 [1] : vector<8x8xf32> to vector<8xf32>
    %55 = vector.shape_cast %54 : vector<8xf32> to vector<8x1xf32>
    %56 = tpu.reciprocal %55 : vector<8x1xf32> -> vector<8x1xf32>
    %57 = vector.broadcast %56 : vector<8x1xf32> to vector<8x8xf32>
    %58 = arith.mulf %53, %57 : vector<8x8xf32>
    %59 = arith.truncf %58 : vector<8x8xf32> to vector<8x8xbf16>
    %60 = vector.extract_strided_slice %25 {offsets = [0, 8], sizes = [8, 8], strides = [1, 1]} : vector<8x32xbf16> to vector<8x8xbf16>
    %cst_21 = arith.constant dense<0.000000e+00> : vector<8x8xf32>
    %61 = tpu.matmul %59, %60, %cst_21 {dimension_numbers = #tpu.dot_dimension_numbers<[1], [0], [0], [1], [0, 0, 1, 1], [], []>} : vector<8x8xbf16>, vector<8x8xbf16>, vector<8x8xf32> -> vector<8x8xf32>
    %62 = vector.extract_strided_slice %19 {offsets = [0, 16], sizes = [8, 8], strides = [1, 1]} : vector<8x32xbf16> to vector<8x8xbf16>
    %63 = vector.extract_strided_slice %22 {offsets = [0, 16], sizes = [8, 8], strides = [1, 1]} : vector<8x32xbf16> to vector<8x8xbf16>
    %cst_22 = arith.constant dense<0.000000e+00> : vector<8x8xf32>
    %64 = tpu.matmul %62, %63, %cst_22 {dimension_numbers = #tpu.dot_dimension_numbers<[1], [1], [0], [0], [0, 0, 1, 0], [], []>} : vector<8x8xbf16>, vector<8x8xbf16>, vector<8x8xf32> -> vector<8x8xf32>
    %cst_23 = arith.constant 0.353553385 : f32
    %65 = vector.broadcast %cst_23 : f32 to vector<8x8xf32>
    %66 = arith.mulf %64, %65 : vector<8x8xf32>
    %cst_24 = arith.constant dense<0xFF800000> : vector<8xf32>
    %67 = vector.multi_reduction <maximumf>, %66, %cst_24 [1] : vector<8x8xf32> to vector<8xf32>
    %68 = vector.shape_cast %67 : vector<8xf32> to vector<8x1xf32>
    %69 = vector.broadcast %68 : vector<8x1xf32> to vector<8x8xf32>
    %70 = arith.subf %66, %69 : vector<8x8xf32>
    %71 = math.exp %70 : vector<8x8xf32>
    %cst_25 = arith.constant dense<0.000000e+00> : vector<8xf32>
    %72 = vector.multi_reduction <add>, %71, %cst_25 [1] : vector<8x8xf32> to vector<8xf32>
    %73 = vector.shape_cast %72 : vector<8xf32> to vector<8x1xf32>
    %74 = tpu.reciprocal %73 : vector<8x1xf32> -> vector<8x1xf32>
    %75 = vector.broadcast %74 : vector<8x1xf32> to vector<8x8xf32>
    %76 = arith.mulf %71, %75 : vector<8x8xf32>
    %77 = arith.truncf %76 : vector<8x8xf32> to vector<8x8xbf16>
    %78 = vector.extract_strided_slice %25 {offsets = [0, 16], sizes = [8, 8], strides = [1, 1]} : vector<8x32xbf16> to vector<8x8xbf16>
    %cst_26 = arith.constant dense<0.000000e+00> : vector<8x8xf32>
    %79 = tpu.matmul %77, %78, %cst_26 {dimension_numbers = #tpu.dot_dimension_numbers<[1], [0], [0], [1], [0, 0, 1, 1], [], []>} : vector<8x8xbf16>, vector<8x8xbf16>, vector<8x8xf32> -> vector<8x8xf32>
    %80 = vector.extract_strided_slice %19 {offsets = [0, 24], sizes = [8, 8], strides = [1, 1]} : vector<8x32xbf16> to vector<8x8xbf16>
    %81 = vector.extract_strided_slice %22 {offsets = [0, 24], sizes = [8, 8], strides = [1, 1]} : vector<8x32xbf16> to vector<8x8xbf16>
    %cst_27 = arith.constant dense<0.000000e+00> : vector<8x8xf32>
    %82 = tpu.matmul %80, %81, %cst_27 {dimension_numbers = #tpu.dot_dimension_numbers<[1], [1], [0], [0], [0, 0, 1, 0], [], []>} : vector<8x8xbf16>, vector<8x8xbf16>, vector<8x8xf32> -> vector<8x8xf32>
    %cst_28 = arith.constant 0.353553385 : f32
    %83 = vector.broadcast %cst_28 : f32 to vector<8x8xf32>
    %84 = arith.mulf %82, %83 : vector<8x8xf32>
    %cst_29 = arith.constant dense<0xFF800000> : vector<8xf32>
    %85 = vector.multi_reduction <maximumf>, %84, %cst_29 [1] : vector<8x8xf32> to vector<8xf32>
    %86 = vector.shape_cast %85 : vector<8xf32> to vector<8x1xf32>
    %87 = vector.broadcast %86 : vector<8x1xf32> to vector<8x8xf32>
    %88 = arith.subf %84, %87 : vector<8x8xf32>
    %89 = math.exp %88 : vector<8x8xf32>
    %cst_30 = arith.constant dense<0.000000e+00> : vector<8xf32>
    %90 = vector.multi_reduction <add>, %89, %cst_30 [1] : vector<8x8xf32> to vector<8xf32>
    %91 = vector.shape_cast %90 : vector<8xf32> to vector<8x1xf32>
    %92 = tpu.reciprocal %91 : vector<8x1xf32> -> vector<8x1xf32>
    %93 = vector.broadcast %92 : vector<8x1xf32> to vector<8x8xf32>
    %94 = arith.mulf %89, %93 : vector<8x8xf32>
    %95 = arith.truncf %94 : vector<8x8xf32> to vector<8x8xbf16>
    %96 = vector.extract_strided_slice %25 {offsets = [0, 24], sizes = [8, 8], strides = [1, 1]} : vector<8x32xbf16> to vector<8x8xbf16>
    %cst_31 = arith.constant dense<0.000000e+00> : vector<8x8xf32>
    %97 = tpu.matmul %95, %96, %cst_31 {dimension_numbers = #tpu.dot_dimension_numbers<[1], [0], [0], [1], [0, 0, 1, 1], [], []>} : vector<8x8xbf16>, vector<8x8xbf16>, vector<8x8xf32> -> vector<8x8xf32>
    %98 = tpu.concatenate %43, %61, %79, %97 in 1 : vector<8x8xf32>, vector<8x8xf32>, vector<8x8xf32>, vector<8x8xf32> -> vector<8x32xf32>
    %99 = arith.truncf %98 : vector<8x32xf32> to vector<8x32xbf16>
    %100 = arith.index_cast %c0_i32_2 : i32 to index
    %c0_32 = arith.constant 0 : index
    %c0_33 = arith.constant 0 : index
    %101 = vector.load %arg9[%100, %c0_32, %c0_33] : memref<1x32x32xbf16, #tpu.memory_space<vmem>>, vector<1x32x32xbf16>
    %102 = vector.shape_cast %101 : vector<1x32x32xbf16> to vector<32x32xbf16>
    %cst_34 = arith.constant dense<0.000000e+00> : vector<8x32xf32>
    %103 = tpu.matmul %99, %102, %cst_34 {dimension_numbers = #tpu.dot_dimension_numbers<[1], [0], [0], [1], [0, 0, 1, 1], [], []>} : vector<8x32xbf16>, vector<32x32xbf16>, vector<8x32xf32> -> vector<8x32xf32>
    %104 = arith.addf %9, %103 : vector<8x32xf32>
    %c1_i32 = arith.constant 1 : i32
    %c0_35 = arith.constant 0 : index
    %c0_36 = arith.constant 0 : index
    %105 = vector.load %arg10[%c0_35, %c0_36] : memref<1x32xf32, #tpu.memory_space<vmem>>, vector<1x32xf32>
    %106 = vector.broadcast %105 : vector<1x32xf32> to vector<8x32xf32>
    %107 = arith.addf %104, %106 : vector<8x32xf32>
    %108 = arith.addf %7, %107 : vector<8x32xf32>
    %c0_37 = arith.constant 0 : index
    %c0_38 = arith.constant 0 : index
    %109 = vector.load %arg11[%c0_37, %c0_38] : memref<1x32xf32, #tpu.memory_space<vmem>>, vector<1x32xf32>
    %c0_39 = arith.constant 0 : index
    %c0_40 = arith.constant 0 : index
    %110 = vector.load %arg12[%c0_39, %c0_40] : memref<1x32xf32, #tpu.memory_space<vmem>>, vector<1x32xf32>
    %cst_41 = arith.constant dense<0.000000e+00> : vector<8xf32>
    %111 = vector.multi_reduction <add>, %108, %cst_41 [1] : vector<8x32xf32> to vector<8xf32>
    %112 = vector.shape_cast %111 : vector<8xf32> to vector<8x1xf32>
    %cst_42 = arith.constant 3.200000e+01 : f32
    %113 = vector.broadcast %cst_42 : f32 to vector<8x1xf32>
    %114 = arith.divf %112, %113 : vector<8x1xf32>
    %115 = vector.broadcast %114 : vector<8x1xf32> to vector<8x32xf32>
    %116 = arith.subf %108, %115 : vector<8x32xf32>
    %117 = arith.mulf %116, %116 : vector<8x32xf32>
    %cst_43 = arith.constant dense<0.000000e+00> : vector<8xf32>
    %118 = vector.multi_reduction <add>, %117, %cst_43 [1] : vector<8x32xf32> to vector<8xf32>
    %119 = vector.shape_cast %118 : vector<8xf32> to vector<8x1xf32>
    %cst_44 = arith.constant 3.200000e+01 : f32
    %120 = vector.broadcast %cst_44 : f32 to vector<8x1xf32>
    %121 = arith.divf %119, %120 : vector<8x1xf32>
    %cst_45 = arith.constant 9.99999974E-6 : f32
    %122 = vector.broadcast %cst_45 : f32 to vector<8x1xf32>
    %123 = arith.addf %121, %122 : vector<8x1xf32>
    %124 = math.rsqrt %123 : vector<8x1xf32>
    %125 = vector.broadcast %124 : vector<8x1xf32> to vector<8x32xf32>
    %126 = arith.mulf %116, %125 : vector<8x32xf32>
    %127 = vector.broadcast %109 : vector<1x32xf32> to vector<8x32xf32>
    %128 = arith.mulf %126, %127 : vector<8x32xf32>
    %129 = vector.broadcast %110 : vector<1x32xf32> to vector<8x32xf32>
    %130 = arith.addf %128, %129 : vector<8x32xf32>
    %131 = arith.truncf %130 : vector<8x32xf32> to vector<8x32xbf16>
    %cst_46 = arith.constant 0.000000e+00 : f32
    %132 = vector.broadcast %cst_46 : f32 to vector<8x32xf32>
    %c0_i32_47 = arith.constant 0 : i32
    %133 = arith.index_cast %c0_i32_47 : i32 to index
    %c0_48 = arith.constant 0 : index
    %c0_49 = arith.constant 0 : index
    %134 = vector.load %arg13[%133, %c0_48, %c0_49] : memref<1x32x64xbf16, #tpu.memory_space<vmem>>, vector<1x32x64xbf16>
    %135 = vector.shape_cast %134 : vector<1x32x64xbf16> to vector<32x64xbf16>
    %cst_50 = arith.constant dense<0.000000e+00> : vector<8x64xf32>
    %136 = tpu.matmul %131, %135, %cst_50 {dimension_numbers = #tpu.dot_dimension_numbers<[1], [0], [0], [1], [0, 0, 1, 1], [], []>} : vector<8x32xbf16>, vector<32x64xbf16>, vector<8x64xf32> -> vector<8x64xf32>
    %137 = arith.index_cast %c0_i32_47 : i32 to index
    %c0_51 = arith.constant 0 : index
    %c0_52 = arith.constant 0 : index
    %138 = vector.load %arg14[%137, %c0_51, %c0_52] : memref<1x1x64xf32, #tpu.memory_space<vmem>>, vector<1x1x64xf32>
    %139 = vector.shape_cast %138 : vector<1x1x64xf32> to vector<1x64xf32>
    %140 = vector.broadcast %139 : vector<1x64xf32> to vector<8x64xf32>
    %141 = arith.addf %136, %140 : vector<8x64xf32>
    %cst_53 = arith.constant 0.000000e+00 : f32
    %142 = vector.broadcast %cst_53 : f32 to vector<8x64xf32>
    %143 = arith.maximumf %141, %142 : vector<8x64xf32>
    %144 = arith.truncf %143 : vector<8x64xf32> to vector<8x64xbf16>
    %145 = arith.index_cast %c0_i32_47 : i32 to index
    %c0_54 = arith.constant 0 : index
    %c0_55 = arith.constant 0 : index
    %146 = vector.load %arg15[%145, %c0_54, %c0_55] : memref<1x64x32xbf16, #tpu.memory_space<vmem>>, vector<1x64x32xbf16>
    %147 = vector.shape_cast %146 : vector<1x64x32xbf16> to vector<64x32xbf16>
    %cst_56 = arith.constant dense<0.000000e+00> : vector<8x32xf32>
    %148 = tpu.matmul %144, %147, %cst_56 {dimension_numbers = #tpu.dot_dimension_numbers<[1], [0], [0], [1], [0, 0, 1, 1], [], []>} : vector<8x64xbf16>, vector<64x32xbf16>, vector<8x32xf32> -> vector<8x32xf32>
    %149 = arith.addf %132, %148 : vector<8x32xf32>
    %c1_i32_57 = arith.constant 1 : i32
    %c0_58 = arith.constant 0 : index
    %c0_59 = arith.constant 0 : index
    %150 = vector.load %arg16[%c0_58, %c0_59] : memref<1x32xf32, #tpu.memory_space<vmem>>, vector<1x32xf32>
    %151 = vector.broadcast %150 : vector<1x32xf32> to vector<8x32xf32>
    %152 = arith.addf %149, %151 : vector<8x32xf32>
    %153 = arith.addf %130, %152 : vector<8x32xf32>
    %c0_60 = arith.constant 0 : index
    %c0_61 = arith.constant 0 : index
    %154 = vector.load %arg17[%c0_60, %c0_61] : memref<1x32xf32, #tpu.memory_space<vmem>>, vector<1x32xf32>
    %c0_62 = arith.constant 0 : index
    %c0_63 = arith.constant 0 : index
    %155 = vector.load %arg18[%c0_62, %c0_63] : memref<1x32xf32, #tpu.memory_space<vmem>>, vector<1x32xf32>
    %cst_64 = arith.constant dense<0.000000e+00> : vector<8xf32>
    %156 = vector.multi_reduction <add>, %153, %cst_64 [1] : vector<8x32xf32> to vector<8xf32>
    %157 = vector.shape_cast %156 : vector<8xf32> to vector<8x1xf32>
    %cst_65 = arith.constant 3.200000e+01 : f32
    %158 = vector.broadcast %cst_65 : f32 to vector<8x1xf32>
    %159 = arith.divf %157, %158 : vector<8x1xf32>
    %160 = vector.broadcast %159 : vector<8x1xf32> to vector<8x32xf32>
    %161 = arith.subf %153, %160 : vector<8x32xf32>
    %162 = arith.mulf %161, %161 : vector<8x32xf32>
    %cst_66 = arith.constant dense<0.000000e+00> : vector<8xf32>
    %163 = vector.multi_reduction <add>, %162, %cst_66 [1] : vector<8x32xf32> to vector<8xf32>
    %164 = vector.shape_cast %163 : vector<8xf32> to vector<8x1xf32>
    %cst_67 = arith.constant 3.200000e+01 : f32
    %165 = vector.broadcast %cst_67 : f32 to vector<8x1xf32>
    %166 = arith.divf %164, %165 : vector<8x1xf32>
    %cst_68 = arith.constant 9.99999974E-6 : f32
    %167 = vector.broadcast %cst_68 : f32 to vector<8x1xf32>
    %168 = arith.addf %166, %167 : vector<8x1xf32>
    %169 = math.rsqrt %168 : vector<8x1xf32>
    %170 = vector.broadcast %169 : vector<8x1xf32> to vector<8x32xf32>
    %171 = arith.mulf %161, %170 : vector<8x32xf32>
    %172 = vector.broadcast %154 : vector<1x32xf32> to vector<8x32xf32>
    %173 = arith.mulf %171, %172 : vector<8x32xf32>
    %174 = vector.broadcast %155 : vector<1x32xf32> to vector<8x32xf32>
    %175 = arith.addf %173, %174 : vector<8x32xf32>
    %c0_69 = arith.constant 0 : index
    %c0_70 = arith.constant 0 : index
    %c0_71 = arith.constant 0 : index
    %176 = vector.load %arg19[%c0_69, %c0_70, %c0_71] : memref<1x8x32xf32, #tpu.memory_space<vmem>>, vector<1x8x32xf32>
    %177 = vector.shape_cast %176 : vector<1x8x32xf32> to vector<8x32xf32>
    %178 = vector.shape_cast %175 : vector<8x32xf32> to vector<1x8x32xf32>
    tpu.vector_store %arg19[%c0_69, %c0_70, %c0_71], %178 {strides = array<i32>} : memref<1x8x32xf32, #tpu.memory_space<vmem>>, vector<1x8x32xf32>,
    return
  }
  func.func @transform_0(%arg0: i32, %arg1: i32) -> (i32, i32, i32) {
    %c0_i32 = arith.constant 0 : i32
    %c0_i32_0 = arith.constant 0 : i32
    %c0_i32_1 = arith.constant 0 : i32
    return %arg0, %c0_i32, %c0_i32_0 : i32, i32, i32
  }
  func.func @transform_1(%arg0: i32, %arg1: i32) -> (i32, i32, i32) {
    %c0_i32 = arith.constant 0 : i32
    %c0_i32_0 = arith.constant 0 : i32
    %c0_i32_1 = arith.constant 0 : i32
    %c0_i32_2 = arith.constant 0 : i32
    return %c0_i32, %c0_i32_0, %c0_i32_1 : i32, i32, i32
  }
  func.func @transform_2(%arg0: i32, %arg1: i32) -> (i32, i32, i32) {
    %c0_i32 = arith.constant 0 : i32
    %c0_i32_0 = arith.constant 0 : i32
    %c0_i32_1 = arith.constant 0 : i32
    %c0_i32_2 = arith.constant 0 : i32
    return %c0_i32, %c0_i32_0, %c0_i32_1 : i32, i32, i32
  }
  func.func @transform_3(%arg0: i32, %arg1: i32) -> (i32, i32, i32) {
    %c0_i32 = arith.constant 0 : i32
    %c0_i32_0 = arith.constant 0 : i32
    %c0_i32_1 = arith.constant 0 : i32
    %c0_i32_2 = arith.constant 0 : i32
    return %c0_i32, %c0_i32_0, %c0_i32_1 : i32, i32, i32
  }
  func.func @transform_4(%arg0: i32, %arg1: i32) -> (i32, i32, i32) {
    %c0_i32 = arith.constant 0 : i32
    %c0_i32_0 = arith.constant 0 : i32
    %c0_i32_1 = arith.constant 0 : i32
    %c0_i32_2 = arith.constant 0 : i32
    return %c0_i32, %c0_i32_0, %c0_i32_1 : i32, i32, i32
  }
  func.func @transform_5(%arg0: i32, %arg1: i32) -> (i32, i32, i32) {
    %c0_i32 = arith.constant 0 : i32
    %c0_i32_0 = arith.constant 0 : i32
    %c0_i32_1 = arith.constant 0 : i32
    %c0_i32_2 = arith.constant 0 : i32
    return %c0_i32, %c0_i32_0, %c0_i32_1 : i32, i32, i32
  }
  func.func @transform_6(%arg0: i32, %arg1: i32) -> (i32, i32, i32) {
    %c0_i32 = arith.constant 0 : i32
    %c0_i32_0 = arith.constant 0 : i32
    %c0_i32_1 = arith.constant 0 : i32
    %c0_i32_2 = arith.constant 0 : i32
    return %c0_i32, %c0_i32_0, %c0_i32_1 : i32, i32, i32
  }
  func.func @transform_7(%arg0: i32, %arg1: i32) -> (i32, i32, i32) {
    %c0_i32 = arith.constant 0 : i32
    %c0_i32_0 = arith.constant 0 : i32
    %c0_i32_1 = arith.constant 0 : i32
    %c0_i32_2 = arith.constant 0 : i32
    return %c0_i32, %c0_i32_0, %c0_i32_1 : i32, i32, i32
  }
  func.func @transform_8(%arg0: i32, %arg1: i32) -> (i32, i32) {
    %c0_i32 = arith.constant 0 : i32
    %c0_i32_0 = arith.constant 0 : i32
    %c0_i32_1 = arith.constant 0 : i32
    return %c0_i32, %c0_i32_0 : i32, i32
  }
  func.func @transform_9(%arg0: i32, %arg1: i32) -> (i32, i32) {
    %c0_i32 = arith.constant 0 : i32
    %c0_i32_0 = arith.constant 0 : i32
    %c0_i32_1 = arith.constant 0 : i32
    return %c0_i32, %c0_i32_0 : i32, i32
  }
  func.func @transform_10(%arg0: i32, %arg1: i32) -> (i32, i32) {
    %c0_i32 = arith.constant 0 : i32
    %c0_i32_0 = arith.constant 0 : i32
    %c0_i32_1 = arith.constant 0 : i32
    return %c0_i32, %c0_i32_0 : i32, i32
  }
  func.func @transform_11(%arg0: i32, %arg1: i32) -> (i32, i32, i32) {
    %c0_i32 = arith.constant 0 : i32
    %c0_i32_0 = arith.constant 0 : i32
    %c0_i32_1 = arith.constant 0 : i32
    %c0_i32_2 = arith.constant 0 : i32
    return %c0_i32, %c0_i32_0, %c0_i32_1 : i32, i32, i32
  }
  func.func @transform_12(%arg0: i32, %arg1: i32) -> (i32, i32, i32) {
    %c0_i32 = arith.constant 0 : i32
    %c0_i32_0 = arith.constant 0 : i32
    %c0_i32_1 = arith.constant 0 : i32
    %c0_i32_2 = arith.constant 0 : i32
    return %c0_i32, %c0_i32_0, %c0_i32_1 : i32, i32, i32
  }
  func.func @transform_13(%arg0: i32, %arg1: i32) -> (i32, i32, i32) {
    %c0_i32 = arith.constant 0 : i32
    %c0_i32_0 = arith.constant 0 : i32
    %c0_i32_1 = arith.constant 0 : i32
    %c0_i32_2 = arith.constant 0 : i32
    return %c0_i32, %c0_i32_0, %c0_i32_1 : i32, i32, i32
  }
  func.func @transform_14(%arg0: i32, %arg1: i32) -> (i32, i32) {
    %c0_i32 = arith.constant 0 : i32
    %c0_i32_0 = arith.constant 0 : i32
    %c0_i32_1 = arith.constant 0 : i32
    return %c0_i32, %c0_i32_0 : i32, i32
  }
  func.func @transform_15(%arg0: i32, %arg1: i32) -> (i32, i32) {
    %c0_i32 = arith.constant 0 : i32
    %c0_i32_0 = arith.constant 0 : i32
    %c0_i32_1 = arith.constant 0 : i32
    return %c0_i32, %c0_i32_0 : i32, i32
  }
  func.func @transform_16(%arg0: i32, %arg1: i32) -> (i32, i32) {
    %c0_i32 = arith.constant 0 : i32
    %c0_i32_0 = arith.constant 0 : i32
    %c0_i32_1 = arith.constant 0 : i32
    return %c0_i32, %c0_i32_0 : i32, i32
  }
  func.func @transform_17(%arg0: i32, %arg1: i32) -> (i32, i32, i32) {
    %c0_i32 = arith.constant 0 : i32
    %c0_i32_0 = arith.constant 0 : i32
    return %arg0, %arg1, %c0_i32 : i32, i32, i32
  }
}

module attributes {stable_mosaic.version = 11 : i64} {
  func.func @encoder_layer_kernel(%arg0: i32, %arg1: i32, %arg2: memref<1x8x32xf32, #tpu.memory_space<vmem>>, %arg3: memref<1x32x32xbf16, #tpu.memory_space<vmem>>, %arg4: memref<1x1x32xf32, #tpu.memory_space<vmem>>, %arg5: memref<1x32x32xbf16, #tpu.memory_space<vmem>>, %arg6: memref<1x1x32xf32, #tpu.memory_space<vmem>>, %arg7: memref<1x32x32xbf16, #tpu.memory_space<vmem>>, %arg8: memref<1x1x32xf32, #tpu.memory_space<vmem>>, %arg9: memref<1x32x32xbf16, #tpu.memory_space<vmem>>, %arg10: memref<1x32xf32, #tpu.memory_space<vmem>>, %arg11: memref<1x32xf32, #tpu.memory_space<vmem>>, %arg12: memref<1x32xf32, #tpu.memory_space<vmem>>, %arg13: memref<1x32x64xbf16, #tpu.memory_space<vmem>>, %arg14: memref<1x1x64xf32, #tpu.memory_space<vmem>>, %arg15: memref<1x64x32xbf16, #tpu.memory_space<vmem>>, %arg16: memref<1x32xf32, #tpu.memory_space<vmem>>, %arg17: memref<1x32xf32, #tpu.memory_space<vmem>>, %arg18: memref<1x32xf32, #tpu.memory_space<vmem>>, %arg19: memref<1x8x32xf32, #tpu.memory_space<vmem>>, %arg20: memref<1x8x32xbf16, #tpu.memory_space<vmem>>, %arg21: memref<1x8x32xbf16, #tpu.memory_space<vmem>>) attributes {dimension_semantics = [#tpu.dimension_semantics<parallel>, #tpu.dimension_semantics<arbitrary>], iteration_bounds = array<i64: 2, 1>, scalar_prefetch = 0 : i64, scratch_operands = 2 : i64, tpu.core_type = #tpu.core_type<tc>, window_params = [{transform_indices = @transform_0, window_bounds = array<i64: 1, 8, 32>}, {pipeline_mode = #tpu.pipeline_mode<synchronous>, transform_indices = @transform_1, window_bounds = array<i64: 1, 32, 32>}, {pipeline_mode = #tpu.pipeline_mode<synchronous>, transform_indices = @transform_2, window_bounds = array<i64: 1, 1, 32>}, {pipeline_mode = #tpu.pipeline_mode<synchronous>, transform_indices = @transform_3, window_bounds = array<i64: 1, 32, 32>}, {pipeline_mode = #tpu.pipeline_mode<synchronous>, transform_indices = @transform_4, window_bounds = array<i64: 1, 1, 32>}, {pipeline_mode = #tpu.pipeline_mode<synchronous>, transform_indices = @transform_5, window_bounds = array<i64: 1, 32, 32>}, {pipeline_mode = #tpu.pipeline_mode<synchronous>, transform_indices = @transform_6, window_bounds = array<i64: 1, 1, 32>}, {pipeline_mode = #tpu.pipeline_mode<synchronous>, transform_indices = @transform_7, window_bounds = array<i64: 1, 32, 32>}, {pipeline_mode = #tpu.pipeline_mode<synchronous>, transform_indices = @transform_8, window_bounds = array<i64: 1, 32>}, {pipeline_mode = #tpu.pipeline_mode<synchronous>, transform_indices = @transform_9, window_bounds = array<i64: 1, 32>}, {pipeline_mode = #tpu.pipeline_mode<synchronous>, transform_indices = @transform_10, window_bounds = array<i64: 1, 32>}, {pipeline_mode = #tpu.pipeline_mode<synchronous>, transform_indices = @transform_11, window_bounds = array<i64: 1, 32, 64>}, {pipeline_mode = #tpu.pipeline_mode<synchronous>, transform_indices = @transform_12, window_bounds = array<i64: 1, 1, 64>}, {pipeline_mode = #tpu.pipeline_mode<synchronous>, transform_indices = @transform_13, window_bounds = array<i64: 1, 64, 32>}, {pipeline_mode = #tpu.pipeline_mode<synchronous>, transform_indices = @transform_14, window_bounds = array<i64: 1, 32>}, {pipeline_mode = #tpu.pipeline_mode<synchronous>, transform_indices = @transform_15, window_bounds = array<i64: 1, 32>}, {pipeline_mode = #tpu.pipeline_mode<synchronous>, transform_indices = @transform_16, window_bounds = array<i64: 1, 32>}, {transform_indices = @transform_17, window_bounds = array<i64: 1, 8, 32>}]} {
    %c0_i32 = arith.constant 0 : i32
    %0 = arith.cmpi eq, %arg1, %c0_i32 : i32
    %1 = arith.extui %0 : i1 to i32
    %c0_i32_0 = arith.constant 0 : i32
    %2 = arith.cmpi ne, %1, %c0_i32_0 : i32
    scf.if %2 {
      %c0_72 = arith.constant 0 : index
      %c0_73 = arith.constant 0 : index
      %c0_74 = arith.constant 0 : index
      %179 = vector.load %arg2[%c0_72, %c0_73, %c0_74] : memref<1x8x32xf32, #tpu.memory_space<vmem>>, vector<1x8x32xf32>
      %180 = vector.shape_cast %179 : vector<1x8x32xf32> to vector<8x32xf32>
      %181 = arith.truncf %180 : vector<8x32xf32> to vector<8x32xbf16>
      %c0_i32_75 = arith.constant 0 : i32
      %182 = arith.index_cast %c0_i32_75 : i32 to index
      %c0_76 = arith.constant 0 : index
      %c0_77 = arith.constant 0 : index
      %183 = vector.load %arg5[%182, %c0_76, %c0_77] : memref<1x32x32xbf16, #tpu.memory_space<vmem>>, vector<1x32x32xbf16>
      %184 = vector.shape_cast %183 : vector<1x32x32xbf16> to vector<32x32xbf16>
      %cst_78 = arith.constant dense<0.000000e+00> : vector<8x32xf32>
      %185 = tpu.matmul %181, %184, %cst_78 {dimension_numbers = #tpu.dot_dimension_numbers<[1], [0], [0], [1], [0, 0, 1, 1], [], []>} : vector<8x32xbf16>, vector<32x32xbf16>, vector<8x32xf32> -> vector<8x32xf32>
      %186 = arith.index_cast %c0_i32_75 : i32 to index
      %c0_79 = arith.constant 0 : index
      %c0_80 = arith.constant 0 : index
      %187 = vector.load %arg6[%186, %c0_79, %c0_80] : memref<1x1x32xf32, #tpu.memory_space<vmem>>, vector<1x1x32xf32>
      %188 = vector.shape_cast %187 : vector<1x1x32xf32> to vector<1x32xf32>
      %189 = vector.broadcast %188 : vector<1x32xf32> to vector<8x32xf32>
      %190 = arith.addf %185, %189 : vector<8x32xf32>
      %191 = arith.truncf %190 : vector<8x32xf32> to vector<8x32xbf16>
      %192 = arith.index_cast %c0_i32_75 : i32 to index
      %c0_81 = arith.constant 0 : index
      %c0_82 = arith.constant 0 : index
      %193 = vector.load %arg20[%192, %c0_81, %c0_82] : memref<1x8x32xbf16, #tpu.memory_space<vmem>>, vector<1x8x32xbf16>
      %194 = vector.shape_cast %193 : vector<1x8x32xbf16> to vector<8x32xbf16>
      %195 = vector.shape_cast %191 : vector<8x32xbf16> to vector<1x8x32xbf16>
      tpu.vector_store %arg20[%192, %c0_81, %c0_82], %195 {strides = array<i32>} : memref<1x8x32xbf16, #tpu.memory_space<vmem>>, vector<1x8x32xbf16>,
      %196 = arith.index_cast %c0_i32_75 : i32 to index
      %c0_83 = arith.constant 0 : index
      %c0_84 = arith.constant 0 : index
      %197 = vector.load %arg7[%196, %c0_83, %c0_84] : memref<1x32x32xbf16, #tpu.memory_space<vmem>>, vector<1x32x32xbf16>
      %198 = vector.shape_cast %197 : vector<1x32x32xbf16> to vector<32x32xbf16>
      %cst_85 = arith.constant dense<0.000000e+00> : vector<8x32xf32>
      %199 = tpu.matmul %181, %198, %cst_85 {dimension_numbers = #tpu.dot_dimension_numbers<[1], [0], [0], [1], [0, 0, 1, 1], [], []>} : vector<8x32xbf16>, vector<32x32xbf16>, vector<8x32xf32> -> vector<8x32xf32>
      %200 = arith.index_cast %c0_i32_75 : i32 to index
      %c0_86 = arith.constant 0 : index
      %c0_87 = arith.constant 0 : index
      %201 = vector.load %arg8[%200, %c0_86, %c0_87] : memref<1x1x32xf32, #tpu.memory_space<vmem>>, vector<1x1x32xf32>
      %202 = vector.shape_cast %201 : vector<1x1x32xf32> to vector<1x32xf32>
      %203 = vector.broadcast %202 : vector<1x32xf32> to vector<8x32xf32>
      %204 = arith.addf %199, %203 : vector<8x32xf32>
      %205 = arith.truncf %204 : vector<8x32xf32> to vector<8x32xbf16>
      %206 = arith.index_cast %c0_i32_75 : i32 to index
      %c0_88 = arith.constant 0 : index
      %c0_89 = arith.constant 0 : index
      %207 = vector.load %arg21[%206, %c0_88, %c0_89] : memref<1x8x32xbf16, #tpu.memory_space<vmem>>, vector<1x8x32xbf16>
      %208 = vector.shape_cast %207 : vector<1x8x32xbf16> to vector<8x32xbf16>
      %209 = vector.shape_cast %205 : vector<8x32xbf16> to vector<1x8x32xbf16>
      tpu.vector_store %arg21[%206, %c0_88, %c0_89], %209 {strides = array<i32>} : memref<1x8x32xbf16, #tpu.memory_space<vmem>>, vector<1x8x32xbf16>,
      %c1_i32_90 = arith.constant 1 : i32
    } else {
    }
    %c8_i32 = arith.constant 8 : i32
    %3 = arith.muli %arg1, %c8_i32 : i32
    %4 = tpu.assume_multiple %3, 8 : i32
    %c0 = arith.constant 0 : index
    %5 = arith.index_cast %4 : i32 to index
    %c0_1 = arith.constant 0 : index
    %6 = vector.load %arg2[%c0, %5, %c0_1] : memref<1x8x32xf32, #tpu.memory_space<vmem>>, vector<1x8x32xf32>
    %7 = vector.shape_cast %6 : vector<1x8x32xf32> to vector<8x32xf32>
    %8 = arith.truncf %7 : vector<8x32xf32> to vector<8x32xbf16>
    %cst = arith.constant 0.000000e+00 : f32
    %9 = vector.broadcast %cst : f32 to vector<8x32xf32>
    %c0_i32_2 = arith.constant 0 : i32
    %10 = arith.index_cast %c0_i32_2 : i32 to index
    %c0_3 = arith.constant 0 : index
    %c0_4 = arith.constant 0 : index
    %11 = vector.load %arg3[%10, %c0_3, %c0_4] : memref<1x32x32xbf16, #tpu.memory_space<vmem>>, vector<1x32x32xbf16>
    %12 = vector.shape_cast %11 : vector<1x32x32xbf16> to vector<32x32xbf16>
    %cst_5 = arith.constant dense<0.000000e+00> : vector<8x32xf32>
    %13 = tpu.matmul %8, %12, %cst_5 {dimension_numbers = #tpu.dot_dimension_numbers<[1], [0], [0], [1], [0, 0, 1, 1], [], []>} : vector<8x32xbf16>, vector<32x32xbf16>, vector<8x32xf32> -> vector<8x32xf32>
    %14 = arith.index_cast %c0_i32_2 : i32 to index
    %c0_6 = arith.constant 0 : index
    %c0_7 = arith.constant 0 : index
    %15 = vector.load %arg4[%14, %c0_6, %c0_7] : memref<1x1x32xf32, #tpu.memory_space<vmem>>, vector<1x1x32xf32>
    %16 = vector.shape_cast %15 : vector<1x1x32xf32> to vector<1x32xf32>
    %17 = vector.broadcast %16 : vector<1x32xf32> to vector<8x32xf32>
    %18 = arith.addf %13, %17 : vector<8x32xf32>
    %19 = arith.truncf %18 : vector<8x32xf32> to vector<8x32xbf16>
    %20 = arith.index_cast %c0_i32_2 : i32 to index
    %c0_8 = arith.constant 0 : index
    %c0_9 = arith.constant 0 : index
    %21 = vector.load %arg20[%20, %c0_8, %c0_9] : memref<1x8x32xbf16, #tpu.memory_space<vmem>>, vector<1x8x32xbf16>
    %22 = vector.shape_cast %21 : vector<1x8x32xbf16> to vector<8x32xbf16>
    %23 = arith.index_cast %c0_i32_2 : i32 to index
    %c0_10 = arith.constant 0 : index
    %c0_11 = arith.constant 0 : index
    %24 = vector.load %arg21[%23, %c0_10, %c0_11] : memref<1x8x32xbf16, #tpu.memory_space<vmem>>, vector<1x8x32xbf16>
    %25 = vector.shape_cast %24 : vector<1x8x32xbf16> to vector<8x32xbf16>
    %26 = vector.extract_strided_slice %19 {offsets = [0, 0], sizes = [8, 8], strides = [1, 1]} : vector<8x32xbf16> to vector<8x8xbf16>
    %27 = vector.extract_strided_slice %22 {offsets = [0, 0], sizes = [8, 8], strides = [1, 1]} : vector<8x32xbf16> to vector<8x8xbf16>
    %cst_12 = arith.constant dense<0.000000e+00> : vector<8x8xf32>
    %28 = tpu.matmul %26, %27, %cst_12 {dimension_numbers = #tpu.dot_dimension_numbers<[1], [1], [0], [0], [0, 0, 1, 0], [], []>} : vector<8x8xbf16>, vector<8x8xbf16>, vector<8x8xf32> -> vector<8x8xf32>
    %cst_13 = arith.constant 0.353553385 : f32
    %29 = vector.broadcast %cst_13 : f32 to vector<8x8xf32>
    %30 = arith.mulf %28, %29 : vector<8x8xf32>
    %cst_14 = arith.constant dense<0xFF800000> : vector<8xf32>
    %31 = vector.multi_reduction <maximumf>, %30, %cst_14 [1] : vector<8x8xf32> to vector<8xf32>
    %32 = vector.shape_cast %31 : vector<8xf32> to vector<8x1xf32>
    %33 = vector.broadcast %32 : vector<8x1xf32> to vector<8x8xf32>
    %34 = arith.subf %30, %33 : vector<8x8xf32>
    %35 = math.exp %34 : vector<8x8xf32>
    %cst_15 = arith.constant dense<0.000000e+00> : vector<8xf32>
    %36 = vector.multi_reduction <add>, %35, %cst_15 [1] : vector<8x8xf32> to vector<8xf32>
    %37 = vector.shape_cast %36 : vector<8xf32> to vector<8x1xf32>
    %38 = tpu.reciprocal %37 : vector<8x1xf32> -> vector<8x1xf32>
    %39 = vector.broadcast %38 : vector<8x1xf32> to vector<8x8xf32>
    %40 = arith.mulf %35, %39 : vector<8x8xf32>
    %41 = arith.truncf %40 : vector<8x8xf32> to vector<8x8xbf16>
    %42 = vector.extract_strided_slice %25 {offsets = [0, 0], sizes = [8, 8], strides = [1, 1]} : vector<8x32xbf16> to vector<8x8xbf16>
    %cst_16 = arith.constant dense<0.000000e+00> : vector<8x8xf32>
    %43 = tpu.matmul %41, %42, %cst_16 {dimension_numbers = #tpu.dot_dimension_numbers<[1], [0], [0], [1], [0, 0, 1, 1], [], []>} : vector<8x8xbf16>, vector<8x8xbf16>, vector<8x8xf32> -> vector<8x8xf32>
    %44 = vector.extract_strided_slice %19 {offsets = [0, 8], sizes = [8, 8], strides = [1, 1]} : vector<8x32xbf16> to vector<8x8xbf16>
    %45 = vector.extract_strided_slice %22 {offsets = [0, 8], sizes = [8, 8], strides = [1, 1]} : vector<8x32xbf16> to vector<8x8xbf16>
    %cst_17 = arith.constant dense<0.000000e+00> : vector<8x8xf32>
    %46 = tpu.matmul %44, %45, %cst_17 {dimension_numbers = #tpu.dot_dimension_numbers<[1], [1], [0], [0], [0, 0, 1, 0], [], []>} : vector<8x8xbf16>, vector<8x8xbf16>, vector<8x8xf32> -> vector<8x8xf32>
    %cst_18 = arith.constant 0.353553385 : f32
    %47 = vector.broadcast %cst_18 : f32 to vector<8x8xf32>
    %48 = arith.mulf %46, %47 : vector<8x8xf32>
    %cst_19 = arith.constant dense<0xFF800000> : vector<8xf32>
    %49 = vector.multi_reduction <maximumf>, %48, %cst_19 [1] : vector<8x8xf32> to vector<8xf32>
    %50 = vector.shape_cast %49 : vector<8xf32> to vector<8x1xf32>
    %51 = vector.broadcast %50 : vector<8x1xf32> to vector<8x8xf32>
    %52 = arith.subf %48, %51 : vector<8x8xf32>
    %53 = math.exp %52 : vector<8x8xf32>
    %cst_20 = arith.constant dense<0.000000e+00> : vector<8xf32>
    %54 = vector.multi_reduction <add>, %53, %cst_20 [1] : vector<8x8xf32> to vector<8xf32>
    %55 = vector.shape_cast %54 : vector<8xf32> to vector<8x1xf32>
    %56 = tpu.reciprocal %55 : vector<8x1xf32> -> vector<8x1xf32>
    %57 = vector.broadcast %56 : vector<8x1xf32> to vector<8x8xf32>
    %58 = arith.mulf %53, %57 : vector<8x8xf32>
    %59 = arith.truncf %58 : vector<8x8xf32> to vector<8x8xbf16>
    %60 = vector.extract_strided_slice %25 {offsets = [0, 8], sizes = [8, 8], strides = [1, 1]} : vector<8x32xbf16> to vector<8x8xbf16>
    %cst_21 = arith.constant dense<0.000000e+00> : vector<8x8xf32>
    %61 = tpu.matmul %59, %60, %cst_21 {dimension_numbers = #tpu.dot_dimension_numbers<[1], [0], [0], [1], [0, 0, 1, 1], [], []>} : vector<8x8xbf16>, vector<8x8xbf16>, vector<8x8xf32> -> vector<8x8xf32>
    %62 = vector.extract_strided_slice %19 {offsets = [0, 16], sizes = [8, 8], strides = [1, 1]} : vector<8x32xbf16> to vector<8x8xbf16>
    %63 = vector.extract_strided_slice %22 {offsets = [0, 16], sizes = [8, 8], strides = [1, 1]} : vector<8x32xbf16> to vector<8x8xbf16>
    %cst_22 = arith.constant dense<0.000000e+00> : vector<8x8xf32>
    %64 = tpu.matmul %62, %63, %cst_22 {dimension_numbers = #tpu.dot_dimension_numbers<[1], [1], [0], [0], [0, 0, 1, 0], [], []>} : vector<8x8xbf16>, vector<8x8xbf16>, vector<8x8xf32> -> vector<8x8xf32>
    %cst_23 = arith.constant 0.353553385 : f32
    %65 = vector.broadcast %cst_23 : f32 to vector<8x8xf32>
    %66 = arith.mulf %64, %65 : vector<8x8xf32>
    %cst_24 = arith.constant dense<0xFF800000> : vector<8xf32>
    %67 = vector.multi_reduction <maximumf>, %66, %cst_24 [1] : vector<8x8xf32> to vector<8xf32>
    %68 = vector.shape_cast %67 : vector<8xf32> to vector<8x1xf32>
    %69 = vector.broadcast %68 : vector<8x1xf32> to vector<8x8xf32>
    %70 = arith.subf %66, %69 : vector<8x8xf32>
    %71 = math.exp %70 : vector<8x8xf32>
    %cst_25 = arith.constant dense<0.000000e+00> : vector<8xf32>
    %72 = vector.multi_reduction <add>, %71, %cst_25 [1] : vector<8x8xf32> to vector<8xf32>
    %73 = vector.shape_cast %72 : vector<8xf32> to vector<8x1xf32>
    %74 = tpu.reciprocal %73 : vector<8x1xf32> -> vector<8x1xf32>
    %75 = vector.broadcast %74 : vector<8x1xf32> to vector<8x8xf32>
    %76 = arith.mulf %71, %75 : vector<8x8xf32>
    %77 = arith.truncf %76 : vector<8x8xf32> to vector<8x8xbf16>
    %78 = vector.extract_strided_slice %25 {offsets = [0, 16], sizes = [8, 8], strides = [1, 1]} : vector<8x32xbf16> to vector<8x8xbf16>
    %cst_26 = arith.constant dense<0.000000e+00> : vector<8x8xf32>
    %79 = tpu.matmul %77, %78, %cst_26 {dimension_numbers = #tpu.dot_dimension_numbers<[1], [0], [0], [1], [0, 0, 1, 1], [], []>} : vector<8x8xbf16>, vector<8x8xbf16>, vector<8x8xf32> -> vector<8x8xf32>
    %80 = vector.extract_strided_slice %19 {offsets = [0, 24], sizes = [8, 8], strides = [1, 1]} : vector<8x32xbf16> to vector<8x8xbf16>
    %81 = vector.extract_strided_slice %22 {offsets = [0, 24], sizes = [8, 8], strides = [1, 1]} : vector<8x32xbf16> to vector<8x8xbf16>
    %cst_27 = arith.constant dense<0.000000e+00> : vector<8x8xf32>
    %82 = tpu.matmul %80, %81, %cst_27 {dimension_numbers = #tpu.dot_dimension_numbers<[1], [1], [0], [0], [0, 0, 1, 0], [], []>} : vector<8x8xbf16>, vector<8x8xbf16>, vector<8x8xf32> -> vector<8x8xf32>
    %cst_28 = arith.constant 0.353553385 : f32
    %83 = vector.broadcast %cst_28 : f32 to vector<8x8xf32>
    %84 = arith.mulf %82, %83 : vector<8x8xf32>
    %cst_29 = arith.constant dense<0xFF800000> : vector<8xf32>
    %85 = vector.multi_reduction <maximumf>, %84, %cst_29 [1] : vector<8x8xf32> to vector<8xf32>
    %86 = vector.shape_cast %85 : vector<8xf32> to vector<8x1xf32>
    %87 = vector.broadcast %86 : vector<8x1xf32> to vector<8x8xf32>
    %88 = arith.subf %84, %87 : vector<8x8xf32>
    %89 = math.exp %88 : vector<8x8xf32>
    %cst_30 = arith.constant dense<0.000000e+00> : vector<8xf32>
    %90 = vector.multi_reduction <add>, %89, %cst_30 [1] : vector<8x8xf32> to vector<8xf32>
    %91 = vector.shape_cast %90 : vector<8xf32> to vector<8x1xf32>
    %92 = tpu.reciprocal %91 : vector<8x1xf32> -> vector<8x1xf32>
    %93 = vector.broadcast %92 : vector<8x1xf32> to vector<8x8xf32>
    %94 = arith.mulf %89, %93 : vector<8x8xf32>
    %95 = arith.truncf %94 : vector<8x8xf32> to vector<8x8xbf16>
    %96 = vector.extract_strided_slice %25 {offsets = [0, 24], sizes = [8, 8], strides = [1, 1]} : vector<8x32xbf16> to vector<8x8xbf16>
    %cst_31 = arith.constant dense<0.000000e+00> : vector<8x8xf32>
    %97 = tpu.matmul %95, %96, %cst_31 {dimension_numbers = #tpu.dot_dimension_numbers<[1], [0], [0], [1], [0, 0, 1, 1], [], []>} : vector<8x8xbf16>, vector<8x8xbf16>, vector<8x8xf32> -> vector<8x8xf32>
    %98 = tpu.concatenate %43, %61, %79, %97 in 1 : vector<8x8xf32>, vector<8x8xf32>, vector<8x8xf32>, vector<8x8xf32> -> vector<8x32xf32>
    %99 = arith.truncf %98 : vector<8x32xf32> to vector<8x32xbf16>
    %100 = arith.index_cast %c0_i32_2 : i32 to index
    %c0_32 = arith.constant 0 : index
    %c0_33 = arith.constant 0 : index
    %101 = vector.load %arg9[%100, %c0_32, %c0_33] : memref<1x32x32xbf16, #tpu.memory_space<vmem>>, vector<1x32x32xbf16>
    %102 = vector.shape_cast %101 : vector<1x32x32xbf16> to vector<32x32xbf16>
    %cst_34 = arith.constant dense<0.000000e+00> : vector<8x32xf32>
    %103 = tpu.matmul %99, %102, %cst_34 {dimension_numbers = #tpu.dot_dimension_numbers<[1], [0], [0], [1], [0, 0, 1, 1], [], []>} : vector<8x32xbf16>, vector<32x32xbf16>, vector<8x32xf32> -> vector<8x32xf32>
    %104 = arith.addf %9, %103 : vector<8x32xf32>
    %c1_i32 = arith.constant 1 : i32
    %c0_35 = arith.constant 0 : index
    %c0_36 = arith.constant 0 : index
    %105 = vector.load %arg10[%c0_35, %c0_36] : memref<1x32xf32, #tpu.memory_space<vmem>>, vector<1x32xf32>
    %106 = vector.broadcast %105 : vector<1x32xf32> to vector<8x32xf32>
    %107 = arith.addf %104, %106 : vector<8x32xf32>
    %108 = arith.addf %7, %107 : vector<8x32xf32>
    %c0_37 = arith.constant 0 : index
    %c0_38 = arith.constant 0 : index
    %109 = vector.load %arg11[%c0_37, %c0_38] : memref<1x32xf32, #tpu.memory_space<vmem>>, vector<1x32xf32>
    %c0_39 = arith.constant 0 : index
    %c0_40 = arith.constant 0 : index
    %110 = vector.load %arg12[%c0_39, %c0_40] : memref<1x32xf32, #tpu.memory_space<vmem>>, vector<1x32xf32>
    %cst_41 = arith.constant dense<0.000000e+00> : vector<8xf32>
    %111 = vector.multi_reduction <add>, %108, %cst_41 [1] : vector<8x32xf32> to vector<8xf32>
    %112 = vector.shape_cast %111 : vector<8xf32> to vector<8x1xf32>
    %cst_42 = arith.constant 3.200000e+01 : f32
    %113 = vector.broadcast %cst_42 : f32 to vector<8x1xf32>
    %114 = arith.divf %112, %113 : vector<8x1xf32>
    %115 = vector.broadcast %114 : vector<8x1xf32> to vector<8x32xf32>
    %116 = arith.subf %108, %115 : vector<8x32xf32>
    %117 = arith.mulf %116, %116 : vector<8x32xf32>
    %cst_43 = arith.constant dense<0.000000e+00> : vector<8xf32>
    %118 = vector.multi_reduction <add>, %117, %cst_43 [1] : vector<8x32xf32> to vector<8xf32>
    %119 = vector.shape_cast %118 : vector<8xf32> to vector<8x1xf32>
    %cst_44 = arith.constant 3.200000e+01 : f32
    %120 = vector.broadcast %cst_44 : f32 to vector<8x1xf32>
    %121 = arith.divf %119, %120 : vector<8x1xf32>
    %cst_45 = arith.constant 9.99999974E-6 : f32
    %122 = vector.broadcast %cst_45 : f32 to vector<8x1xf32>
    %123 = arith.addf %121, %122 : vector<8x1xf32>
    %124 = math.rsqrt %123 : vector<8x1xf32>
    %125 = vector.broadcast %124 : vector<8x1xf32> to vector<8x32xf32>
    %126 = arith.mulf %116, %125 : vector<8x32xf32>
    %127 = vector.broadcast %109 : vector<1x32xf32> to vector<8x32xf32>
    %128 = arith.mulf %126, %127 : vector<8x32xf32>
    %129 = vector.broadcast %110 : vector<1x32xf32> to vector<8x32xf32>
    %130 = arith.addf %128, %129 : vector<8x32xf32>
    %131 = arith.truncf %130 : vector<8x32xf32> to vector<8x32xbf16>
    %cst_46 = arith.constant 0.000000e+00 : f32
    %132 = vector.broadcast %cst_46 : f32 to vector<8x32xf32>
    %c0_i32_47 = arith.constant 0 : i32
    %133 = arith.index_cast %c0_i32_47 : i32 to index
    %c0_48 = arith.constant 0 : index
    %c0_49 = arith.constant 0 : index
    %134 = vector.load %arg13[%133, %c0_48, %c0_49] : memref<1x32x64xbf16, #tpu.memory_space<vmem>>, vector<1x32x64xbf16>
    %135 = vector.shape_cast %134 : vector<1x32x64xbf16> to vector<32x64xbf16>
    %cst_50 = arith.constant dense<0.000000e+00> : vector<8x64xf32>
    %136 = tpu.matmul %131, %135, %cst_50 {dimension_numbers = #tpu.dot_dimension_numbers<[1], [0], [0], [1], [0, 0, 1, 1], [], []>} : vector<8x32xbf16>, vector<32x64xbf16>, vector<8x64xf32> -> vector<8x64xf32>
    %137 = arith.index_cast %c0_i32_47 : i32 to index
    %c0_51 = arith.constant 0 : index
    %c0_52 = arith.constant 0 : index
    %138 = vector.load %arg14[%137, %c0_51, %c0_52] : memref<1x1x64xf32, #tpu.memory_space<vmem>>, vector<1x1x64xf32>
    %139 = vector.shape_cast %138 : vector<1x1x64xf32> to vector<1x64xf32>
    %140 = vector.broadcast %139 : vector<1x64xf32> to vector<8x64xf32>
    %141 = arith.addf %136, %140 : vector<8x64xf32>
    %cst_53 = arith.constant 0.000000e+00 : f32
    %142 = vector.broadcast %cst_53 : f32 to vector<8x64xf32>
    %143 = arith.maximumf %141, %142 : vector<8x64xf32>
    %144 = arith.truncf %143 : vector<8x64xf32> to vector<8x64xbf16>
    %145 = arith.index_cast %c0_i32_47 : i32 to index
    %c0_54 = arith.constant 0 : index
    %c0_55 = arith.constant 0 : index
    %146 = vector.load %arg15[%145, %c0_54, %c0_55] : memref<1x64x32xbf16, #tpu.memory_space<vmem>>, vector<1x64x32xbf16>
    %147 = vector.shape_cast %146 : vector<1x64x32xbf16> to vector<64x32xbf16>
    %cst_56 = arith.constant dense<0.000000e+00> : vector<8x32xf32>
    %148 = tpu.matmul %144, %147, %cst_56 {dimension_numbers = #tpu.dot_dimension_numbers<[1], [0], [0], [1], [0, 0, 1, 1], [], []>} : vector<8x64xbf16>, vector<64x32xbf16>, vector<8x32xf32> -> vector<8x32xf32>
    %149 = arith.addf %132, %148 : vector<8x32xf32>
    %c1_i32_57 = arith.constant 1 : i32
    %c0_58 = arith.constant 0 : index
    %c0_59 = arith.constant 0 : index
    %150 = vector.load %arg16[%c0_58, %c0_59] : memref<1x32xf32, #tpu.memory_space<vmem>>, vector<1x32xf32>
    %151 = vector.broadcast %150 : vector<1x32xf32> to vector<8x32xf32>
    %152 = arith.addf %149, %151 : vector<8x32xf32>
    %153 = arith.addf %130, %152 : vector<8x32xf32>
    %c0_60 = arith.constant 0 : index
    %c0_61 = arith.constant 0 : index
    %154 = vector.load %arg17[%c0_60, %c0_61] : memref<1x32xf32, #tpu.memory_space<vmem>>, vector<1x32xf32>
    %c0_62 = arith.constant 0 : index
    %c0_63 = arith.constant 0 : index
    %155 = vector.load %arg18[%c0_62, %c0_63] : memref<1x32xf32, #tpu.memory_space<vmem>>, vector<1x32xf32>
    %cst_64 = arith.constant dense<0.000000e+00> : vector<8xf32>
    %156 = vector.multi_reduction <add>, %153, %cst_64 [1] : vector<8x32xf32> to vector<8xf32>
    %157 = vector.shape_cast %156 : vector<8xf32> to vector<8x1xf32>
    %cst_65 = arith.constant 3.200000e+01 : f32
    %158 = vector.broadcast %cst_65 : f32 to vector<8x1xf32>
    %159 = arith.divf %157, %158 : vector<8x1xf32>
    %160 = vector.broadcast %159 : vector<8x1xf32> to vector<8x32xf32>
    %161 = arith.subf %153, %160 : vector<8x32xf32>
    %162 = arith.mulf %161, %161 : vector<8x32xf32>
    %cst_66 = arith.constant dense<0.000000e+00> : vector<8xf32>
    %163 = vector.multi_reduction <add>, %162, %cst_66 [1] : vector<8x32xf32> to vector<8xf32>
    %164 = vector.shape_cast %163 : vector<8xf32> to vector<8x1xf32>
    %cst_67 = arith.constant 3.200000e+01 : f32
    %165 = vector.broadcast %cst_67 : f32 to vector<8x1xf32>
    %166 = arith.divf %164, %165 : vector<8x1xf32>
    %cst_68 = arith.constant 9.99999974E-6 : f32
    %167 = vector.broadcast %cst_68 : f32 to vector<8x1xf32>
    %168 = arith.addf %166, %167 : vector<8x1xf32>
    %169 = math.rsqrt %168 : vector<8x1xf32>
    %170 = vector.broadcast %169 : vector<8x1xf32> to vector<8x32xf32>
    %171 = arith.mulf %161, %170 : vector<8x32xf32>
    %172 = vector.broadcast %154 : vector<1x32xf32> to vector<8x32xf32>
    %173 = arith.mulf %171, %172 : vector<8x32xf32>
    %174 = vector.broadcast %155 : vector<1x32xf32> to vector<8x32xf32>
    %175 = arith.addf %173, %174 : vector<8x32xf32>
    %c0_69 = arith.constant 0 : index
    %c0_70 = arith.constant 0 : index
    %c0_71 = arith.constant 0 : index
    %176 = vector.load %arg19[%c0_69, %c0_70, %c0_71] : memref<1x8x32xf32, #tpu.memory_space<vmem>>, vector<1x8x32xf32>
    %177 = vector.shape_cast %176 : vector<1x8x32xf32> to vector<8x32xf32>
    %178 = vector.shape_cast %175 : vector<8x32xf32> to vector<1x8x32xf32>
    tpu.vector_store %arg19[%c0_69, %c0_70, %c0_71], %178 {strides = array<i32>} : memref<1x8x32xf32, #tpu.memory_space<vmem>>, vector<1x8x32xf32>,
    return
  }
  func.func @transform_0(%arg0: i32, %arg1: i32) -> (i32, i32, i32) {
    %c0_i32 = arith.constant 0 : i32
    %c0_i32_0 = arith.constant 0 : i32
    %c0_i32_1 = arith.constant 0 : i32
    return %arg0, %c0_i32, %c0_i32_0 : i32, i32, i32
  }
  func.func @transform_1(%arg0: i32, %arg1: i32) -> (i32, i32, i32) {
    %c0_i32 = arith.constant 0 : i32
    %c0_i32_0 = arith.constant 0 : i32
    %c0_i32_1 = arith.constant 0 : i32
    %c0_i32_2 = arith.constant 0 : i32
    return %c0_i32, %c0_i32_0, %c0_i32_1 : i32, i32, i32
  }
  func.func @transform_2(%arg0: i32, %arg1: i32) -> (i32, i32, i32) {
    %c0_i32 = arith.constant 0 : i32
    %c0_i32_0 = arith.constant 0 : i32
    %c0_i32_1 = arith.constant 0 : i32
    %c0_i32_2 = arith.constant 0 : i32
    return %c0_i32, %c0_i32_0, %c0_i32_1 : i32, i32, i32
  }
  func.func @transform_3(%arg0: i32, %arg1: i32) -> (i32, i32, i32) {
    %c0_i32 = arith.constant 0 : i32
    %c0_i32_0 = arith.constant 0 : i32
    %c0_i32_1 = arith.constant 0 : i32
    %c0_i32_2 = arith.constant 0 : i32
    return %c0_i32, %c0_i32_0, %c0_i32_1 : i32, i32, i32
  }
  func.func @transform_4(%arg0: i32, %arg1: i32) -> (i32, i32, i32) {
    %c0_i32 = arith.constant 0 : i32
    %c0_i32_0 = arith.constant 0 : i32
    %c0_i32_1 = arith.constant 0 : i32
    %c0_i32_2 = arith.constant 0 : i32
    return %c0_i32, %c0_i32_0, %c0_i32_1 : i32, i32, i32
  }
  func.func @transform_5(%arg0: i32, %arg1: i32) -> (i32, i32, i32) {
    %c0_i32 = arith.constant 0 : i32
    %c0_i32_0 = arith.constant 0 : i32
    %c0_i32_1 = arith.constant 0 : i32
    %c0_i32_2 = arith.constant 0 : i32
    return %c0_i32, %c0_i32_0, %c0_i32_1 : i32, i32, i32
  }
  func.func @transform_6(%arg0: i32, %arg1: i32) -> (i32, i32, i32) {
    %c0_i32 = arith.constant 0 : i32
    %c0_i32_0 = arith.constant 0 : i32
    %c0_i32_1 = arith.constant 0 : i32
    %c0_i32_2 = arith.constant 0 : i32
    return %c0_i32, %c0_i32_0, %c0_i32_1 : i32, i32, i32
  }
  func.func @transform_7(%arg0: i32, %arg1: i32) -> (i32, i32, i32) {
    %c0_i32 = arith.constant 0 : i32
    %c0_i32_0 = arith.constant 0 : i32
    %c0_i32_1 = arith.constant 0 : i32
    %c0_i32_2 = arith.constant 0 : i32
    return %c0_i32, %c0_i32_0, %c0_i32_1 : i32, i32, i32
  }
  func.func @transform_8(%arg0: i32, %arg1: i32) -> (i32, i32) {
    %c0_i32 = arith.constant 0 : i32
    %c0_i32_0 = arith.constant 0 : i32
    %c0_i32_1 = arith.constant 0 : i32
    return %c0_i32, %c0_i32_0 : i32, i32
  }
  func.func @transform_9(%arg0: i32, %arg1: i32) -> (i32, i32) {
    %c0_i32 = arith.constant 0 : i32
    %c0_i32_0 = arith.constant 0 : i32
    %c0_i32_1 = arith.constant 0 : i32
    return %c0_i32, %c0_i32_0 : i32, i32
  }
  func.func @transform_10(%arg0: i32, %arg1: i32) -> (i32, i32) {
    %c0_i32 = arith.constant 0 : i32
    %c0_i32_0 = arith.constant 0 : i32
    %c0_i32_1 = arith.constant 0 : i32
    return %c0_i32, %c0_i32_0 : i32, i32
  }
  func.func @transform_11(%arg0: i32, %arg1: i32) -> (i32, i32, i32) {
    %c0_i32 = arith.constant 0 : i32
    %c0_i32_0 = arith.constant 0 : i32
    %c0_i32_1 = arith.constant 0 : i32
    %c0_i32_2 = arith.constant 0 : i32
    return %c0_i32, %c0_i32_0, %c0_i32_1 : i32, i32, i32
  }
  func.func @transform_12(%arg0: i32, %arg1: i32) -> (i32, i32, i32) {
    %c0_i32 = arith.constant 0 : i32
    %c0_i32_0 = arith.constant 0 : i32
    %c0_i32_1 = arith.constant 0 : i32
    %c0_i32_2 = arith.constant 0 : i32
    return %c0_i32, %c0_i32_0, %c0_i32_1 : i32, i32, i32
  }
  func.func @transform_13(%arg0: i32, %arg1: i32) -> (i32, i32, i32) {
    %c0_i32 = arith.constant 0 : i32
    %c0_i32_0 = arith.constant 0 : i32
    %c0_i32_1 = arith.constant 0 : i32
    %c0_i32_2 = arith.constant 0 : i32
    return %c0_i32, %c0_i32_0, %c0_i32_1 : i32, i32, i32
  }
  func.func @transform_14(%arg0: i32, %arg1: i32) -> (i32, i32) {
    %c0_i32 = arith.constant 0 : i32
    %c0_i32_0 = arith.constant 0 : i32
    %c0_i32_1 = arith.constant 0 : i32
    return %c0_i32, %c0_i32_0 : i32, i32
  }
  func.func @transform_15(%arg0: i32, %arg1: i32) -> (i32, i32) {
    %c0_i32 = arith.constant 0 : i32
    %c0_i32_0 = arith.constant 0 : i32
    %c0_i32_1 = arith.constant 0 : i32
    return %c0_i32, %c0_i32_0 : i32, i32
  }
  func.func @transform_16(%arg0: i32, %arg1: i32) -> (i32, i32) {
    %c0_i32 = arith.constant 0 : i32
    %c0_i32_0 = arith.constant 0 : i32
    %c0_i32_1 = arith.constant 0 : i32
    return %c0_i32, %c0_i32_0 : i32, i32
  }
  func.func @transform_17(%arg0: i32, %arg1: i32) -> (i32, i32, i32) {
    %c0_i32 = arith.constant 0 : i32
    %c0_i32_0 = arith.constant 0 : i32
    return %arg0, %arg1, %c0_i32 : i32, i32, i32
  }
}

</mosaic_0001>

<bundles_post_ra>
// kernel: tpu_custom_call.1
= control target key start
LH: loop header
LB: loop body
LE: loop exit
PB: predicated region body
PF: predicated region fallthrough
CT: control target
= control target key end

     0   :  { %s2116_s0 = inlined_call_operand.vmem [shape: f32[2,8,32], index: 0, kind: input, shape index: {}]   ;;  %s2117_s1 = inlined_call_operand.vmem [shape: bf16[1,32,32], index: 1, kind: input, shape index: {}]   ;;  %s2118_s2 = inlined_call_operand.vmem [shape: f32[1,1,32], index: 2, kind: input, shape index: {}]   ;;  %s2119_s3 = inlined_call_operand.vmem [shape: bf16[1,32,32], index: 3, kind: input, shape index: {}]   ;;  %s2120_s4 = inlined_call_operand.vmem [shape: f32[1,1,32], index: 4, kind: input, shape index: {}]   ;;  %s2121_s5 = inlined_call_operand.hbm [shape: bf16[1,32,32], index: 5, kind: input, shape index: {}]   ;;  %s2122_s6 = inlined_call_operand.vmem [shape: f32[1,1,32], index: 6, kind: input, shape index: {}]   ;;  %s2123_s7 = inlined_call_operand.hbm [shape: bf16[1,32,32], index: 7, kind: input, shape index: {}]   ;;  %s2124_s8 = inlined_call_operand.vmem [shape: f32[1,32], index: 8, kind: input, shape index: {}]   ;;  %s2125_s9 = inlined_call_operand.vmem [shape: f32[1,32], index: 9, kind: input, shape index: {}]   ;;  %s2126_s10 = inlined_call_operand.vmem [shape: f32[1,32], index: 10, kind: input, shape index: {}]   ;;  %s2127_s11 = inlined_call_operand.hbm [shape: bf16[1,32,64], index: 11, kind: input, shape index: {}]   ;;  %s2128_s12 = inlined_call_operand.vmem [shape: f32[1,1,64], index: 12, kind: input, shape index: {}]   ;;  %s2129_s13 = inlined_call_operand.vmem [shape: bf16[1,64,32], index: 13, kind: input, shape index: {}]   ;;  %s2130_s14 = inlined_call_operand.vmem [shape: f32[1,32], index: 14, kind: input, shape index: {}]   ;;  %s2131_s15 = inlined_call_operand.vmem [shape: f32[1,32], index: 15, kind: input, shape index: {}]   ;;  %s2132_s16 = inlined_call_operand.vmem [shape: f32[1,32], index: 16, kind: input, shape index: {}]   ;;  %s2133_s17 = inlined_call_operand.hbm [shape: f32[2,8,32], index: 17, kind: output, shape index: {}]  }
   0x1   :  { %2145 = sst [smem:[#allocation22_spill]] %s2116_s0 }
   0x2   :  { %2146 = sst [smem:[#allocation23_spill]] %s2117_s1 }
   0x3   :  { %2147 = sst [smem:[#allocation24_spill]] %s2118_s2 }
   0x4   :  { %2148 = sst [smem:[#allocation25_spill]] %s2123_s7 }
   0x5   :  { %2149 = sst [smem:[#allocation26_spill]] %s2131_s15 }
   0x6   :  { %2150 = sst [smem:[#allocation27_spill]] %s2132_s16 }
   0x7   :  { %2151 = sst [smem:[#allocation28_spill]] %s2133_s17 }
   0x8   :  { %22 = vsyncpa [#allocation5], 0 }
   0x9   :  { %23 = vsyncpa [#allocation8], 0 }
   0xa   :  { %24 = vsyncpa [#allocation6], 0 }
   0xb   :  { %26 = vsyncpa [#allocation6 + $0x1], 0  ;;  %s1865_s24 = smov 0   ;;  %s1867_s25 = smov 0  }
   0xc   :  { %s1869_s26 = smov 0   ;;  %s1871_s27 = smov 0  }
   0xd   :  { %s1873_s28 = smov 0   ;;  %s1875_s29 = smov 0  }
   0xe LB: > { %2152 = sst [smem:[#allocation14_spill]] %s1741_s24  ;;  %s1357_s0 = sadd.s32 4294967295, %s1761_s29   ;;  %s1761_s29 = sphi %s1875_s29, %s32_s29   ;;  %s1757_s28 = sphi %s1873_s28, %s2180_s28   ;;  %s1753_s27 = sphi %s1871_s27, %s2179_s27   ;;  %s1749_s26 = sphi %s1869_s26, %s2178_s26   ;;  %s1745_s25 = sphi %s1867_s25, %s2182_s25   ;;  %s1741_s24 = sphi %s1865_s24, %s2181_s24  }
   0xf   : > { %2153 = sst [smem:[#allocation15_spill]] %s1749_s26  ;;  %s1358_s30 = sadd.s32 4294967294, %s1761_s29  }
  0x10   : > { %2154 = sst [smem:[#allocation16_spill]] %s1757_s28  ;;  %s44_s18 = sadd.s32 1, %s1757_s28 }
  0x11   : > { %2155 = sst [smem:[#allocation17_spill]] %s1761_s29  ;;  %s415_s19 = sadd.s32 1, %s1749_s26 }
  0x12   : > { %p46_p0 = scmp.ge.s32.totalorder %s44_s18, 2  ;;  %p425_p1 = scmp.ne.s32.totalorder %s1749_s26, %s1745_s25 }
  0x13   : > { %p426_p2 = scmp.eq.s32.totalorder %s1357_s0, 1  ;;  %p431_p3 = scmp.ne.s32.totalorder %s1745_s25, %s1741_s24 }
  0x14   : > { %s2184_s18 = smov (%p46_p0, %s44_s18), 0  ;;  %p432_p5 = scmp.eq.s32.totalorder %s1358_s30, 1 }
  0x15   : > { %2156 = sst [smem:[#allocation18_spill]] %s2184_s18  ;;  %p1905_p4 = por %p426_p2, %p425_p1 }
  0x16   : > { %s410_s20 = ssub.s32 %s1757_s28, %s2184_s18  ;;  %p1359_p6 = scmp.ge.s32.totalorder %s1761_s29, 1 }
  0x17   : > { %s2157_s1 = scalar_select %p1905_p4, 1, 0 }
  0x18   : > { %p413_p7 = scmp.eq.s32.totalorder %s410_s20, 0  ;;  %p1912_p8 = por %p432_p5, %p431_p3 }
  0x19   : > { %2158 = sst [smem:[#allocation19_spill]] %s2157_s1  ;;  %p439_p9 = scmp.lt.s32.totalorder %s1761_s29, 3 }
  0x1a   : > { %s2159_s21 = scalar_select %p1912_p8, 1, 0 }
  0x1b   : > { %s1918_s22 = scalar_select %p413_p7, %s1749_s26, %s415_s19  }
  0x1c   : > { %2160 = sst [smem:[#allocation20_spill]] %s2159_s21  ;;  %p1920_p10 = pnand %p1359_p6, %p439_p9 }
  0x1d   : > { %2161 = sst [smem:[#allocation21_spill]] %s1918_s22  ;;  %p1924_p11 = scmp.eq.s32.totalorder %s1357_s0, 0 }
  0x1e   : > { %p1472_p12 = pneg %p1920_p10  ;;  %s2164_s7 = sld [smem:[#allocation25_spill]] }
  0x1f   : > { %s1763_s28 = smov [#allocation7]   ;;  %s1764_s22 = smov 64  }
  0x20   : > { %p1935_p13 = pnand %p1924_p11, %p1472_p12  ;;  %s481_s0 = sshll.u32 %s1763_s28, 4  ;;  %s482_s0 = int_to_ptr.vmem [resolvable:$true] %s481_s0 }
  0x21   : > { %s1765_s26 = smov 4   ;;  %s462_s30 = sshll.u32 %s2121_s5, 4  ;;  %s463_s30 = int_to_ptr.hbm [resolvable:$true] %s462_s30 }
  0x22   : > { %s1766_s20 = smov [#allocation4]   ;;  %s502_s17 = sshll.u32 %s2127_s11, 4  ;;  %s503_s17 = int_to_ptr.hbm [resolvable:$true] %s502_s17 }
  0x23   : > { %s1767_s28 = smov [#allocation9]  }
  0x24   : > { %s479_s18 = sshll.u32 %s2164_s7, 4  ;;  %s464_s7 = sshll.u32 %s1766_s20, 4  ;;  %s480_s18 = int_to_ptr.hbm [resolvable:$true] %s479_s18  ;;  %s465_s7 = int_to_ptr.vmem [resolvable:$true] %s464_s7 }
  0x25   : > { %1478 = dma.hbm_to_vmem [thread:$0]  (!%p1935_p13), %s480_s18, 256, %s482_s0, [#allocation8], %s1764_s22, %s1764_s22, %s1765_s26  }
  0x26   : > { %1475 = dma.hbm_to_vmem [thread:$0]  (!%p1935_p13), %s463_s30, 256, %s465_s7, [#allocation5], %s1764_s22, %s1764_s22, %s1765_s26  }
  0x27   : > { %s504_s15 = sshll.u32 %s1767_s28, 4  ;;  %542 = sbr.rel (%p1920_p10) target bundleno = 1932 (0x78c), region = 88  ;;  %s505_s15 = int_to_ptr.vmem [resolvable:$true] %s504_s15 }
  0x28   : > { %1481 = dma.hbm_to_vmem [thread:$0]  (!%p1935_p13), %s503_s17, 256, %s505_s15, [#allocation8], %s1764_s22, %s1764_s22, %s1765_s26  }
  0x2c   : > { %1728 = dma.done.wait (%p1924_p11), [#allocation5], 256  }
  0x2d   : > { %1730 = vsyncadd (%p1924_p11), [#allocation5], 4294967040 }
  0x2e   : > { %1732 = dma.done.wait (%p1924_p11), [#allocation8], 512  }
  0x2f   : > { %1734 = vsyncadd (%p1924_p11), [#allocation8], 4294966784  ;;  %p604_p0 = scmp.lt.s32.totalorder %s1753_s27, 1  ;;  %s2166_s26 = sld [smem:[#allocation22_spill]]  ;;  %v1445_v0 = vld [vmem:[%s2119_s3 + $0x8] sm:$0xff]  ;;  %v1444_v2 = vld [vmem:[%s2119_s3] sm:$0xff] }
  0x30   : > { %s2167_s23 = sld [smem:[#allocation23_spill]]  ;;  %645 = vmatpush.bf16.msra.mxu0 %v1445_v0  ;;  %vm635_vm0 = vcmask 261120   ;;  %v1553_v6 = vld [vmem:[%s2120_s4] ss:$0 sm:$0xff]  ;;  %vm653_vm1 = vcmask 257024   ;;  %vm734_vm2 = vcmask 64512  }
  0x31   : > { %s605_s7 = scalar_select %p604_p0, %s1753_s27, 1  ;;  %v1447_v22 = vld [vmem:[#allocation4 + $0x8] sm:$0xff]  ;;  %v1446_v23 = vld [vmem:[#allocation4] sm:$0xff]  ;;  %v1555_v37 = vld [vmem:[%s2122_s6] ss:$0 sm:$0xff]  ;;  %vm783_vm3 = vcmask 1043456  }
  0x32   : > { %s2168_s2 = sld [smem:[#allocation24_spill]]  ;;  %s1768_s16 = smov 112   ;;  %681 = vmatpush.bf16.msra.mxu1 %v1447_v22 }
  0x33   : > { %s1369_s15 = sshll.u32 %s605_s7, 3  ;;  %s1769_s17 = smov 120  }
  0x34   : > { %646 = vmatpush.bf16.msra.mxu0 %v1444_v2  ;;  %s1771_s1 = smov 8   ;;  %s1772_s21 = smov 24  }
  0x35   : > { %s607_s29 = scalar_lea.vmem %s2166_s26, %s1369_s15  ;;  %s1770_s26 = smov 104  }
  0x36   : > { %v1449_v1 = vld [vmem:[%s2167_s23 + $0x8] sm:$0xff]  ;;  %v1448_v3 = vld [vmem:[%s2167_s23] sm:$0xff]  ;;  %682 = vmatpush.bf16.msra.mxu1 %v1446_v23  ;;  %s1773_s22 = smov 16   ;;  %s601_s0 = sand.u32 1, %s1745_s25  }
  0x37   : > { %724 = vmatpush.bf16.msra.mxu2 %v1449_v1  ;;  %v1978_v4 = vld [vmem:[%s607_s29] sm:$0xff]  ;;  %s1368_s30 = sshll.u32 %s601_s0, 3  ;;  %s1441_s20 = sshll.u32 %s1753_s27, 3 }
  0x38   : > { %v614_v5 = vpack.c.bf16 %v1978_v4, %v1978_v4  ;;  %v1554_v10 = vld [vmem:[%s2168_s2] ss:$0 sm:$0xff]  ;;  %s2169_s15 = sld [smem:[#allocation26_spill]]  ;;  %s603_s24 = scalar_lea.vmem [#allocation10], %s1368_s30 }
  0x39   : > { %s2173_s19 = sld [smem:[#allocation27_spill]]  ;;  %s1253_s27 = sshll.u32 %s603_s24, 4  ;;  %s1254_s27 = int_to_ptr.vmem [resolvable:$true] %s1253_s27 }
  0x3a   : > { %1378 = vmatmul.msk.bf16.vlgmr.msra.gmra.mxu0 %vm635_vm0, %v614_v5  ;;  %1387 = vmatmul.msk.bf16.vlgmr.msra.gmra.mxu1 %vm635_vm0, %v614_v5  ;;  %s1240_s28 = scalar_lea.sflag [#allocation6], %s601_s0 }
  0x3b   : > { %725 = vmatpush.bf16.msra.mxu2 %v1448_v3 }
  0x3e   : > { %1396 = vmatmul.msk.bf16.vlgmr.msra.gmra.mxu2 %vm635_vm0, %v614_v5 }
  0xb7   : > { %v648_v7 = vpop.f32.mrf.mxu0  ;;  %v684_v38 = vpop.f32.mrf.mxu1 }
  0xb8   : > { %v649_v8 = vadd.f32 %v1553_v6, %v648_v7  ;;  %v685_v39 = vadd.f32 %v1555_v37, %v684_v38 }
  0xba   : > { %v652_v9 = vpack.c.bf16 %v649_v8, %v649_v8  ;;  %v688_v40 = vpack.c.bf16 %v685_v39, %v685_v39 }
  0xbc   : > { %654 = vst.msk [vmem:[#allocation2] sm:$0xf] %vm653_vm1, %v652_v9 }
  0xbd   : > { %689 = vst.msk [vmem:[#allocation3] sm:$0xf] %vm653_vm1, %v688_v40 }
  0xbf   : > { %v650_v13 = vpop.f32.mrf.mxu0  ;;  %v686_v41 = vpop.f32.mrf.mxu1 }
  0xc1   : > { %v727_v11 = vpop.f32.mrf.mxu2 }
  0xc2   : > { %v728_v12 = vadd.f32 %v1554_v10, %v727_v11 }
  0xc3   : > { %v732_v16 = vld [vmem:[#allocation2] sm:$0xf] }
  0xc4   : > { %v731_v14 = vpack.c.bf16 %v728_v12, %v728_v12  ;;  %v739_v18 = vsel %vm734_vm2, %v732_v16, 0  ;;  %v806_v19 = vunpack.c.l.b16 %v732_v16  ;;  %v733_v42 = vld [vmem:[#allocation3] sm:$0xf] }
  0xc5   : > { %748 = vmatpush.bf16.xpose.msra.mxu3 %v739_v18  ;;  %v785_v43 = vsel %vm783_vm3, %v733_v42, 0  ;;  %v856_v12 = vunpack.c.l.b16 %v733_v42 }
  0xc6   : > { %v801_v15 = vunpack.c.l.b16 %v731_v14  ;;  %v807_v21 = vpack.c.b16 %v806_v19, %v806_v19  ;;  %794 = vmatpush.bf16.msrb.mxu0 %v785_v43 }
  0xc8   : > { %v802_v17 = vpack.c.b16 %v801_v15, %v801_v15  ;;  %881 = vrot.lane.b32.xlu1 %v807_v21, %s1768_s16  ;;  %808 = vrot.lane.b32.xlu0 %v807_v21, %s1769_s17 }
  0xc9   : > { %v729_v20 = vpop.f32.mrf.mxu2 }
  0xca   : > { %879 = vrot.lane.b32.xlu2 %v802_v17, %s1768_s16 }
  0xcc   : > { %1397 = vmatmul.msk.bf16.vlgmr.msra.gmra.mxu3 %vm734_vm2, %v731_v14 }
  0xd0   : > { %951 = vrot.lane.b32.xlu1 %v807_v21, %s1770_s26  ;;  %803 = vrot.lane.b32.xlu0 %v802_v17, %s1769_s17  ;;  %v857_v21 = vpack.c.b16 %v856_v12, %v856_v12 }
  0xd2   : > { %949 = vrot.lane.b32.xlu2 %v802_v17, %s1770_s26 }
 0x124   : > { %v880_v28 = vpop.permute.xlu2 %879 }
 0x12c   : > { %v950_v34 = vpop.permute.xlu2 %949 }
 0x13a   : > { %v882_v24 = vpop.permute.xlu1 %881  ;;  %v809_v25 = vpop.permute.xlu0 %808 }
 0x13b   : > { %v814_v26 = vsel %vm734_vm2, %v809_v25, 0  ;;  %v887_v27 = vsel %vm734_vm2, %v882_v24, 0 }
 0x13c   : > { %823 = vmatpush.bf16.xpose.msrb.mxu1 %v814_v26  ;;  %896 = vmatpush.bf16.xpose.msrb.mxu3 %v887_v27 }
 0x142   : > { %v952_v29 = vpop.permute.xlu1 %951  ;;  %v804_v30 = vpop.permute.xlu0 %803 }
 0x143   : > { %v957_v31 = vsel %vm734_vm2, %v952_v29, 0  ;;  %1399 = vmatmul.msk.bf16.vlgmr.msrb.gmra.mxu1 %vm734_vm2, %v804_v30  ;;  %1401 = vmatmul.msk.bf16.vlgmr.msrb.gmra.mxu3 %vm734_vm2, %v880_v28 }
 0x144   : > { %966 = vmatpush.bf16.xpose.msra.mxu1 %v957_v31 }
 0x14f   : > { %v750_v32 = vpop.f32.mrf.mxu3 }
 0x150   : > { %v754_v33 = vmul.f32 0.35355338, %v750_v32 }
 0x152   : > { %v755_v35 = vsel %vm734_vm2, %v754_v33, -inf }
 0x153   : > { %1403 = vmatmul.msk.bf16.vlgmr.msra.gmra.mxu1 %vm734_vm2, %v950_v34  ;;  %756 = vmax.xlane.f32.xlu1 %v755_v35 }
 0x157   : > { %v752_v36 = vpop.f32.mrf.mxu3 }
 0x1c0   : > { %v825_v44 = vpop.f32.mrf.mxu1 }
 0x1c1   : > { %v829_v45 = vmul.f32 0.35355338, %v825_v44 }
 0x1c3   : > { %v830_v46 = vsel %vm734_vm2, %v829_v45, -inf }
 0x1c4   : > { %831 = vmax.xlane.f32.xlu0 %v830_v46 }
 0x1c6   : > { %v757_v47 = vpop.xlane.xlu1 %756  ;;  %v898_v48 = vpop.f32.mrf.mxu3 }
 0x1c7   : > { %v758_v49 = vsub.f32 %v754_v33, %v757_v47  ;;  %v902_v58 = vmul.f32 0.35355338, %v898_v48 }
 0x1c8   : > { %v827_v50 = vpop.f32.mrf.mxu1 }
 0x1c9   : > { %v759_v51 = vmul.f32 1.442695, %v758_v49  ;;  %v903_v60 = vsel %vm734_vm2, %v902_v58, -inf }
 0x1cb   : > { %1563 = vpow2.f32 %v759_v51 }
 0x1ce   : > { %v900_v52 = vpop.f32.mrf.mxu3 }
 0x1d0   : > { %v968_v53 = vpop.f32.mrf.mxu1 }
 0x1d1   : > { %v1564_v54 = vpop.eup %1563  ;;  %v972_v55 = vmul.f32 0.35355338, %v968_v53 }
 0x1d2   : > { %v761_v56 = vsel %vm734_vm2, %v1564_v54, 0.0 }
 0x1d3   : > { %762 = vadd.xlane.f32.xlu1 %v761_v56  ;;  %v973_v57 = vsel %vm734_vm2, %v972_v55, -inf }
 0x1d4   : > { %974 = vmax.xlane.f32.xlu2 %v973_v57 }
 0x1d8   : > { %v970_v59 = vpop.f32.mrf.mxu1 }
 0x1dc   : > { %904 = vmax.xlane.f32.xlu2 %v903_v60 }
 0x237   : > { %v832_v61 = vpop.xlane.xlu0 %831 }
 0x238   : > { %v833_v62 = vsub.f32 %v829_v45, %v832_v61 }
 0x23a   : > { %v834_v63 = vmul.f32 1.442695, %v833_v62 }
 0x23c   : > { %1565 = vpow2.f32 %v834_v63 }
 0x242   : > { %v1566_v0 = vpop.eup %1565 }
 0x243   : > { %v836_v1 = vsel %vm734_vm2, %v1566_v0, 0.0 }
 0x244   : > { %837 = vadd.xlane.f32.xlu0 %v836_v1 }
 0x246   : > { %v763_v2 = vpop.xlane.xlu1 %762 }
 0x247   : > { %1567 = vrcp.f32 %v763_v2  ;;  %v975_v3 = vpop.xlane.xlu2 %974  ;;  %v775_v13 = vand.u32 2147483648, %v763_v2  ;;  %v773_v16 = vand.u32 2147483647, %v763_v2  ;;  %vm769_vm5 = vweird.f32 %v763_v2 }
 0x248   : > { %v976_v5 = vsub.f32 %v972_v55, %v975_v3 }
 0x249   : > { %v776_v20 = vor.u32 1.1754944e-38, %v775_v13  ;;  %vm774_vm7 = vcmp.eq.f32.partialorder %v773_v16, 8.507059e+37 }
 0x24a   : > { %v977_v6 = vmul.f32 1.442695, %v976_v5 }
 0x24c   : > { %1569 = vpow2.f32 %v977_v6 }
 0x24d   : > { %v1568_v7 = vpop.eup %1567 }
 0x24e   : > { %v765_v8 = vmul.f32 %v1568_v7, %v763_v2  ;;  %vm770_vm4 = vweird.f32 %v1568_v7 }
 0x24f   : > { %v905_v9 = vpop.xlane.xlu2 %904  ;;  %vm771_vm6 = vmor %vm769_vm5, %vm770_vm4 }
 0x250   : > { %v766_v10 = vsub.f32 1.0, %v765_v8  ;;  %v906_v11 = vsub.f32 %v902_v58, %v905_v9 }
 0x252   : > { %v2017_v14 = vpop.eup %1569  ;;  %v767_v15 = vmul.f32 %v1568_v7, %v766_v10  ;;  %v907_v17 = vmul.f32 1.442695, %v906_v11 }
 0x253   : > { %v979_v18 = vsel %vm734_vm2, %v2017_v14, 0.0 }
 0x254   : > { %v768_v19 = vadd.f32 %v1568_v7, %v767_v15  ;;  %1571 = vpow2.f32 %v907_v17  ;;  %980 = vadd.xlane.f32.xlu2 %v979_v18  ;;  %v1451_v18 = vld [vmem:[#allocation7 + $0x8] sm:$0xff] }
 0x255   : > { %1066 = vmatpush.bf16.msra.mxu3 %v1451_v18 }
 0x256   : > { %v772_v22 = vsel %vm771_vm6, %v1568_v7, %v768_v19  ;;  %v1450_v19 = vld [vmem:[#allocation7] sm:$0xff] }
 0x257   : > { %v777_v23 = vsel %vm774_vm7, %v776_v20, %v772_v22  ;;  %vm1034_vm7 = vcmask 195584  }
 0x258   : > { %858 = vrot.lane.b32.xlu0 %v857_v21, %s1769_s17  ;;  %v778_v24 = vmul.f32 %v1564_v54, %v777_v23 }
 0x259   : > { %1067 = vmatpush.bf16.msra.mxu3 %v1450_v19 }
 0x25a   : > { %v2022_v25 = vpop.eup %1571  ;;  %v779_v26 = vpack.c.bf16 %v778_v24, %v778_v24 }
 0x25b   : > { %v909_v27 = vsel %vm734_vm2, %v2022_v25, 0.0 }
 0x25c   : > { %1398 = vmatmul.msk.bf16.vlgmr.msrb.gmra.mxu0 %vm734_vm2, %v779_v26  ;;  %910 = vadd.xlane.f32.xlu1 %v909_v27  ;;  %v1556_v27 = vld [vmem:[%s2124_s8] ss:$0 sm:$0xff] }
 0x26c   : > { %998 = vrot.lane.b32.xlu2 %v857_v21, %s1770_s26  ;;  %s2170_s26 = sld [smem:[#allocation28_spill]] }
 0x272   : > { %s2171_s18 = smov %s2170_s26  ;;  %s1251_s29 = scalar_lea.hbm %s2170_s26, %s1441_s20 }
 0x273   : > { %s1255_s2 = sshll.u32 %s1251_s29, 4  ;;  %s1695_s30 = scalar_lea.hbm %s2171_s18, 16  ;;  %s1256_s2 = int_to_ptr.hbm [resolvable:$true] %s1255_s2 }
 0x274   : > { %s1689_s7 = sshra.s32 %s1256_s2, 4  ;;  %s1690_s7 = int_to_ptr.hbm [resolvable:$true] %s1689_s7 }
 0x275   : > { %928 = vrot.lane.b32.xlu1 %v857_v21, %s1768_s16  ;;  %s1691_s20 = scalar_lea.hbm %s1690_s7, 8  ;;  %p1696_p5 = scmp.lt.s32.totalorder %s1690_s7, %s2171_s18 }
 0x276   : > { %p1692_p1 = scmp.ne.s32.totalorder %s1690_s7, %s1691_s20  ;;  %p1697_p6 = scmp.lt.s32.totalorder %s1695_s30, %s1691_s20 }
 0x278   : > { %p1693_p2 = pnand %p1692_p1, %p1905_p4  ;;  %p1698_p7 = por %p1697_p6, %p1696_p5 }
 0x27a   : > { %p1694_p3 = pneg %p1693_p2 }
 0x27c   : > { %p1699_p9 = pnand %p1698_p7, %p1694_p3 }
 0x2b7   : > { %v838_v28 = vpop.xlane.xlu0 %837 }
 0x2b8   : > { %1573 = vrcp.f32 %v838_v28  ;;  %v850_v33 = vand.u32 2147483648, %v838_v28  ;;  %v848_v34 = vand.u32 2147483647, %v838_v28  ;;  %vm844_vm9 = vweird.f32 %v838_v28 }
 0x2ba   : > { %v851_v36 = vor.u32 1.1754944e-38, %v850_v33  ;;  %vm849_vm11 = vcmp.eq.f32.partialorder %v848_v34, 8.507059e+37  ;;  %v1774_v33 = vmov 32.0  }
 0x2be   : > { %v1574_v29 = vpop.eup %1573 }
 0x2bf   : > { %v840_v30 = vmul.f32 %v1574_v29, %v838_v28  ;;  %vm845_vm8 = vweird.f32 %v1574_v29 }
 0x2c0   : > { %vm846_vm10 = vmor %vm844_vm9, %vm845_vm8 }
 0x2c1   : > { %v841_v31 = vsub.f32 1.0, %v840_v30 }
 0x2c3   : > { %v842_v32 = vmul.f32 %v1574_v29, %v841_v31 }
 0x2c5   : > { %v843_v35 = vadd.f32 %v1574_v29, %v842_v32 }
 0x2c7   : > { %v981_v37 = vpop.xlane.xlu2 %980  ;;  %v847_v38 = vsel %vm846_vm10, %v1574_v29, %v843_v35 }
 0x2c8   : > { %1575 = vrcp.f32 %v981_v37  ;;  %v852_v39 = vsel %vm849_vm11, %v851_v36, %v847_v38  ;;  %v993_v50 = vand.u32 2147483648, %v981_v37  ;;  %v991_v52 = vand.u32 2147483647, %v981_v37 }
 0x2c9   : > { %v853_v41 = vmul.f32 %v1566_v0, %v852_v39  ;;  %vm987_vm13 = vweird.f32 %v981_v37  ;;  %vm1188_vm11 = vcmask 523264  }
 0x2ca   : > { %v859_v40 = vpop.permute.xlu0 %858  ;;  %v994_v55 = vor.u32 1.1754944e-38, %v993_v50  ;;  %vm992_vm15 = vcmp.eq.f32.partialorder %v991_v52, 8.507059e+37 }
 0x2cb   : > { %v864_v42 = vsel %vm783_vm3, %v859_v40, 0  ;;  %v854_v43 = vpack.c.bf16 %v853_v41, %v853_v41 }
 0x2cc   : > { %873 = vmatpush.bf16.msrb.mxu2 %v864_v42 }
 0x2ce   : > { %v1576_v44 = vpop.eup %1575 }
 0x2cf   : > { %v983_v45 = vmul.f32 %v1576_v44, %v981_v37  ;;  %1400 = vmatmul.msk.bf16.vlgmr.msrb.gmra.mxu2 %vm734_vm2, %v854_v43  ;;  %v911_v46 = vpop.xlane.xlu1 %910  ;;  %v999_v47 = vpop.permute.xlu2 %998  ;;  %vm988_vm12 = vweird.f32 %v1576_v44 }
 0x2d0   : > { %1577 = vrcp.f32 %v911_v46  ;;  %v1004_v49 = vsel %vm783_vm3, %v999_v47, 0  ;;  %vm989_vm14 = vmor %vm987_vm13, %vm988_vm12  ;;  %v923_v0 = vand.u32 2147483648, %v911_v46  ;;  %vm917_vm4 = vweird.f32 %v911_v46 }
 0x2d1   : > { %v984_v48 = vsub.f32 1.0, %v983_v45  ;;  %1013 = vmatpush.bf16.msra.mxu2 %v1004_v49  ;;  %v921_v2 = vand.u32 2147483647, %v911_v46  ;;  %1579 = vrcp.f32 %v1774_v33  ;;  %v1452_v45 = vld [vmem:[#allocation9] sm:$0xff]  ;;  %v1456_v49 = vld [vmem:[%s2129_s13 + $0x10] sm:$0xff] }
 0x2d2   : > { %v924_v5 = vor.u32 1.1754944e-38, %v923_v0  ;;  %v1455_v0 = vld [vmem:[%s2129_s13 + $0x8] sm:$0xff] }
 0x2d3   : > { %v985_v51 = vmul.f32 %v1576_v44, %v984_v48  ;;  %vm922_vm6 = vcmp.eq.f32.partialorder %v921_v2, 8.507059e+37  ;;  %v1559_v2 = vld [vmem:[%s2128_s12] ss:$0 sm:$0xff] }
 0x2d5   : > { %v986_v53 = vadd.f32 %v1576_v44, %v985_v51 }
 0x2d6   : > { %v1578_v54 = vpop.eup %1577 }
 0x2d7   : > { %v990_v56 = vsel %vm989_vm14, %v1576_v44, %v986_v53  ;;  %v913_v57 = vmul.f32 %v1578_v54, %v911_v46  ;;  %vm918_vm1 = vweird.f32 %v1578_v54  ;;  %v1580_v34 = vpop.eup %1579  ;;  %v1457_v46 = vld [vmem:[%s2129_s13 + $0x18] sm:$0xff] }
 0x2d8   : > { %v995_v58 = vsel %vm992_vm15, %v994_v55, %v990_v56  ;;  %vm919_vm5 = vmor %vm917_vm4, %vm918_vm1  ;;  %v1080_v35 = vmul.f32 32.0, %v1580_v34  ;;  %1196 = vmatpush.bf16.msrb.mxu1 %v1457_v46 }
 0x2d9   : > { %v996_v59 = vmul.f32 %v2017_v14, %v995_v58  ;;  %v914_v60 = vsub.f32 1.0, %v913_v57  ;;  %v796_v61 = vpop.f32.mrf.mxu0  ;;  %v1557_v57 = vld [vmem:[%s2125_s9] ss:$0 sm:$0xff] }
 0x2da   : > { %v1081_v36 = vsub.f32 1.0, %v1080_v35 }
 0x2db   : > { %v915_v62 = vmul.f32 %v1578_v54, %v914_v60  ;;  %v997_v1 = vpack.c.bf16 %v996_v59, %v996_v59  ;;  %v1558_v59 = vld [vmem:[%s2126_s10] ss:$0 sm:$0xff] }
 0x2dc   : > { %v1082_v37 = vmul.f32 %v1580_v34, %v1081_v36  ;;  %1197 = vmatpush.bf16.msrb.mxu1 %v1456_v49 }
 0x2dd   : > { %v916_v63 = vadd.f32 %v1578_v54, %v915_v62 }
 0x2de   : > { %v1083_v38 = vadd.f32 %v1580_v34, %v1082_v37 }
 0x2df   : > { %1404 = vmatmul.msk.bf16.vlgmr.msra.gmra.mxu2 %vm734_vm2, %v997_v1  ;;  %v920_v3 = vsel %vm919_vm5, %v1578_v54, %v916_v63  ;;  %v1454_v1 = vld [vmem:[%s2129_s13] sm:$0xff] }
 0x2e0   : > { %v925_v7 = vsel %vm922_vm6, %v924_v5, %v920_v3  ;;  %1198 = vmatpush.bf16.msrb.mxu1 %v1455_v0 }
 0x2e1   : > { %v798_v6 = vpop.f32.mrf.mxu0  ;;  %v926_v8 = vmul.f32 %v2022_v25, %v925_v7 }
 0x2e3   : > { %v927_v11 = vpack.c.bf16 %v926_v8, %v926_v8 }
 0x2e4   : > { %1199 = vmatpush.bf16.msrb.mxu1 %v1454_v1 }
 0x2e7   : > { %v929_v9 = vpop.permute.xlu1 %928 }
 0x2e8   : > { %v934_v10 = vsel %vm783_vm3, %v929_v9, 0  ;;  %vm1032_vm3 = vcmask 130048   ;;  %v1560_v9 = vld [vmem:[%s2130_s14] ss:$0 sm:$0xff] }
 0x2e9   : > { %943 = vmatpush.bf16.msra.mxu0 %v934_v10 }
 0x2ec   : > { %1402 = vmatmul.msk.bf16.vlgmr.msra.gmra.mxu0 %vm734_vm2, %v927_v11 }
 0x352   : > { %v875_v12 = vpop.f32.mrf.mxu2 }
 0x353   : > { %1020 = vrot.lane.b32.xlu0 %v875_v12, %s1771_s1 }
 0x35a   : > { %v877_v13 = vpop.f32.mrf.mxu2 }
 0x362   : > { %v1015_v14 = vpop.f32.mrf.mxu2 }
 0x363   : > { %1028 = vrot.lane.b32.xlu2 %v1015_v14, %s1772_s21 }
 0x369   : > { %v945_v15 = vpop.f32.mrf.mxu0 }
 0x36a   : > { %1024 = vrot.lane.b32.xlu0 %v945_v15, %s1773_s22  ;;  %v1017_v16 = vpop.f32.mrf.mxu2 }
 0x371   : > { %v947_v17 = vpop.f32.mrf.mxu0 }
 0x3bd   : > { %v1029_v23 = vpop.permute.xlu2 %1028 }
 0x3c5   : > { %v1021_v20 = vpop.permute.xlu0 %1020 }
 0x3c6   : > { %v1031_v21 = vsel %vm734_vm2, %v796_v61, %v1021_v20  ;;  %vm1084_vm2 = vweird.f32 %v1580_v34 }
 0x3c7   : > { %v1085_v39 = vsel %vm1084_vm2, %v1580_v34, %v1083_v38 }
 0x3dc   : > { %v1025_v22 = vpop.permute.xlu0 %1024 }
 0x3dd   : > { %v1033_v24 = vsel %vm1032_vm3, %v1031_v21, %v1025_v22 }
 0x3de   : > { %v1035_v25 = vsel %vm1034_vm7, %v1033_v24, %v1029_v23 }
 0x3df   : > { %v1036_v26 = vpack.c.bf16 %v1035_v25, %v1035_v25 }
 0x3e1   : > { %1413 = vmatmul.msk.bf16.vlgmr.msra.gmra.mxu3 %vm635_vm0, %v1036_v26 }
 0x464   : > { %v1069_v28 = vpop.f32.mrf.mxu3 }
 0x465   : > { %v1070_v29 = vadd.f32 %v1556_v27, %v1069_v28 }
 0x467   : > { %v1073_v30 = vadd.f32 %v1070_v29, %v1978_v4  ;;  %v1453_v4 = vld [vmem:[#allocation9 + $0x8] sm:$0xff]  ;;  %v1561_v29 = vld [vmem:[%s2169_s15] ss:$0 sm:$0xff] }
 0x468   : > { %1143 = vmatpush.bf16.msrb.mxu0 %v1453_v4 }
 0x469   : > { %v1076_v31 = vsel %vm635_vm0, %v1073_v30, 0.0 }
 0x46a   : > { %1077 = vadd.xlane.f32.xlu1 %v1076_v31 }
 0x46c   : > { %v1071_v32 = vpop.f32.mrf.mxu3  ;;  %1144 = vmatpush.bf16.msrb.mxu0 %v1452_v45 }
 0x46d   : > { %v1562_v32 = vld [vmem:[%s2173_s19] ss:$0 sm:$0xff] }
 0x4dd   : > { %v1078_v40 = vpop.xlane.xlu1 %1077 }
 0x4de   : > { %v1086_v41 = vmul.f32 %v1085_v39, %v1078_v40 }
 0x4e0   : > { %v1087_v42 = vsub.f32 %v1073_v30, %v1086_v41 }
 0x4e2   : > { %v1088_v43 = vmul.f32 %v1087_v42, %v1087_v42 }
 0x4e4   : > { %v1089_v44 = vsel %vm635_vm0, %v1088_v43, 0.0 }
 0x4e5   : > { %1090 = vadd.xlane.f32.xlu0 %v1089_v44 }
 0x558   : > { %v1091_v47 = vpop.xlane.xlu0 %1090 }
 0x559   : > { %v1092_v48 = vmul.f32 %v1091_v47, %v1085_v39 }
 0x55b   : > { %v1093_v50 = vadd.f32 1e-05, %v1092_v48 }
 0x55d   : > { %1581 = vrsqrt.f32 %v1093_v50  ;;  %vm1100_vm9 = vweird.f32 %v1093_v50 }
 0x563   : > { %v1582_v51 = vpop.eup %1581 }
 0x564   : > { %v1095_v52 = vmul.f32 %v1582_v51, %v1093_v50  ;;  %vm1101_vm8 = vweird.f32 %v1582_v51 }
 0x565   : > { %vm1102_vm10 = vmor %vm1100_vm9, %vm1101_vm8 }
 0x566   : > { %v1096_v53 = vmul.f32 %v1582_v51, %v1095_v52 }
 0x568   : > { %v1097_v54 = vmul.f32 0.5, %v1096_v53 }
 0x56a   : > { %v1098_v55 = vsub.f32 1.5, %v1097_v54 }
 0x56c   : > { %v1099_v56 = vmul.f32 %v1582_v51, %v1098_v55 }
 0x56e   : > { %v1103_v58 = vsel %vm1102_vm10, %v1582_v51, %v1099_v56 }
 0x56f   : > { %v1104_v60 = vmul.f32 %v1103_v58, %v1087_v42 }
 0x571   : > { %v1108_v61 = vmul.f32 %v1557_v57, %v1104_v60 }
 0x573   : > { %v1112_v62 = vadd.f32 %v1558_v59, %v1108_v61 }
 0x575   : > { %v1113_v63 = vpack.c.bf16 %v1112_v62, %v1112_v62 }
 0x577   : > { %1422 = vmatmul.msk.bf16.vlgmr.msrb.gmra.mxu0 %vm635_vm0, %v1113_v63 }
 0x5f4   : > { %v1146_v3 = vpop.f32.mrf.mxu0 }
 0x5f5   : > { %v1147_v5 = vadd.f32 %v1559_v2, %v1146_v3 }
 0x5f7   : > { %v1150_v6 = vmax.f32 %v1147_v5, 0.0 }
 0x5f9   : > { %v1151_v7 = vpack.c.bf16 %v1150_v6, %v1150_v6 }
 0x5fb   : > { %1439 = vmatmul.msk.bf16.vlgmr.msrb.gmra.mxu1 %vm1188_vm11, %v1151_v7 }
 0x5fc   : > { %v1148_v8 = vpop.f32.mrf.mxu0 }
 0x678   : > { %v1201_v10 = vpop.f32.mrf.mxu1 }
 0x679   : > { %v1202_v11 = vadd.f32 %v1560_v9, %v1201_v10 }
 0x67b   : > { %v1205_v12 = vadd.f32 %v1202_v11, %v1112_v62 }
 0x67d   : > { %v1208_v13 = vsel %vm635_vm0, %v1205_v12, 0.0 }
 0x67e   : > { %1209 = vadd.xlane.f32.xlu2 %v1208_v13 }
 0x680   : > { %v1203_v14 = vpop.f32.mrf.mxu1 }
 0x6f1   : > { %v1210_v15 = vpop.xlane.xlu2 %1209 }
 0x6f2   : > { %v1211_v16 = vmul.f32 %v1210_v15, %v1085_v39 }
 0x6f4   : > { %v1212_v17 = vsub.f32 %v1205_v12, %v1211_v16 }
 0x6f6   : > { %v1213_v18 = vmul.f32 %v1212_v17, %v1212_v17 }
 0x6f8   : > { %v1214_v19 = vsel %vm635_vm0, %v1213_v18, 0.0 }
 0x6f9   : > { %1215 = vadd.xlane.f32.xlu1 %v1214_v19 }
 0x76c   : > { %v1216_v20 = vpop.xlane.xlu1 %1215 }
 0x76d   : > { %v1217_v21 = vmul.f32 %v1216_v20, %v1085_v39 }
 0x76f   : > { %v1218_v22 = vadd.f32 1e-05, %v1217_v21 }
 0x771   : > { %1583 = vrsqrt.f32 %v1218_v22  ;;  %vm1225_vm13 = vweird.f32 %v1218_v22 }
 0x777   : > { %v1584_v23 = vpop.eup %1583 }
 0x778   : > { %v1220_v24 = vmul.f32 %v1584_v23, %v1218_v22  ;;  %vm1226_vm12 = vweird.f32 %v1584_v23 }
 0x779   : > { %vm1227_vm14 = vmor %vm1225_vm13, %vm1226_vm12 }
 0x77a   : > { %v1221_v25 = vmul.f32 %v1584_v23, %v1220_v24 }
 0x77c   : > { %v1222_v26 = vmul.f32 0.5, %v1221_v25 }
 0x77e   : > { %v1223_v27 = vsub.f32 1.5, %v1222_v26 }
 0x780   : > { %v1224_v28 = vmul.f32 %v1584_v23, %v1223_v27 }
 0x782   : > { %v1228_v30 = vsel %vm1227_vm14, %v1584_v23, %v1224_v28 }
 0x783   : > { %v1229_v31 = vmul.f32 %v1228_v30, %v1212_v17 }
 0x785   : > { %v1233_v33 = vmul.f32 %v1561_v29, %v1229_v31 }
 0x787   : > { %v1237_v34 = vadd.f32 %v1562_v32, %v1233_v33 }
 0x789   : > { %1238 = vst.msk [vmem:[%s603_s24] sm:$0xff] %vm635_vm0, %v1237_v34 }
 0x78a   : > { %1702 = shalt.err (!%p1699_p9)
}
 0x78b   : > { %1470 = dma.vmem_to_hbm [thread:$0]  (%p1905_p4), %s1254_s27, 128, %s1256_s2, %s1240_s28  }
 0x78c PF: > { %s2174_s0 = sld [smem:[#allocation17_spill]] }
 0x78d   : > { %s2175_s29 = sld [smem:[#allocation14_spill]] }
 0x792   : > { %p1492_p10 = scmp.ge.s32.totalorder %s2174_s0, 2 }
 0x793   : > { %s1267_s22 = sand.u32 1, %s2175_s29  }
 0x794   : > { %p1483_p11 = pnand %p1492_p10, %p1912_p8  ;;  %s1268_s19 = scalar_lea.sflag [#allocation6], %s1267_s22 }
 0x796   : > { %p1484_p12 = pneg %p1483_p11 }
 0x798   : > { %1736 = dma.done.wait (%p1484_p12), %s1268_s19, 128  }
 0x799   : > { %1738 = vsyncadd (%p1484_p12), %s1268_s19, 4294967168  ;;  %s32_s29 = sadd.s32 1, %s2174_s0   ;;  %s2177_s7 = sld [smem:[#allocation15_spill]] }
 0x79a   : > { %p29_p13 = scmp.ge.s32.totalorder %s32_s29, 4   ;;  %s2178_s26 = sld [smem:[#allocation21_spill]] }
 0x79b   : > { %s2179_s27 = sld [smem:[#allocation16_spill]]  ;;  %s2181_s24 = smov %s1745_s25 }
 0x79c   : > { %s2180_s28 = sld [smem:[#allocation18_spill]]  ;;  %31 = sbr.rel (!%p29_p13) target bundleno = 14 (0xe), region = 141 }
 0x79f   : > { %s2182_s25 = smov %s2177_s7 }
 0x7a1   :  { %1274 = vsyncpa [#allocation5], 1 }
 0x7a2   :  { %1276 = vsyncpa [#allocation5 + $0x1], 1 }
 0x7a3   :  { %1277 = vsyncpa [#allocation8], 1 }
 0x7a4   :  { %1278 = vsyncpa [#allocation6], 1 }
 0x7a5   :  { %1280 = vsyncpa [#allocation6 + $0x1], 1 }

// kernel: tpu_custom_call.1
= control target key start
LH: loop header
LB: loop body
LE: loop exit
PB: predicated region body
PF: predicated region fallthrough
CT: control target
= control target key end

     0   :  { %s2116_s0 = inlined_call_operand.vmem [shape: f32[2,8,32], index: 0, kind: input, shape index: {}]   ;;  %s2117_s1 = inlined_call_operand.vmem [shape: bf16[1,32,32], index: 1, kind: input, shape index: {}]   ;;  %s2118_s2 = inlined_call_operand.vmem [shape: f32[1,1,32], index: 2, kind: input, shape index: {}]   ;;  %s2119_s3 = inlined_call_operand.vmem [shape: bf16[1,32,32], index: 3, kind: input, shape index: {}]   ;;  %s2120_s4 = inlined_call_operand.vmem [shape: f32[1,1,32], index: 4, kind: input, shape index: {}]   ;;  %s2121_s5 = inlined_call_operand.hbm [shape: bf16[1,32,32], index: 5, kind: input, shape index: {}]   ;;  %s2122_s6 = inlined_call_operand.vmem [shape: f32[1,1,32], index: 6, kind: input, shape index: {}]   ;;  %s2123_s7 = inlined_call_operand.hbm [shape: bf16[1,32,32], index: 7, kind: input, shape index: {}]   ;;  %s2124_s8 = inlined_call_operand.vmem [shape: f32[1,32], index: 8, kind: input, shape index: {}]   ;;  %s2125_s9 = inlined_call_operand.vmem [shape: f32[1,32], index: 9, kind: input, shape index: {}]   ;;  %s2126_s10 = inlined_call_operand.vmem [shape: f32[1,32], index: 10, kind: input, shape index: {}]   ;;  %s2127_s11 = inlined_call_operand.hbm [shape: bf16[1,32,64], index: 11, kind: input, shape index: {}]   ;;  %s2128_s12 = inlined_call_operand.vmem [shape: f32[1,1,64], index: 12, kind: input, shape index: {}]   ;;  %s2129_s13 = inlined_call_operand.vmem [shape: bf16[1,64,32], index: 13, kind: input, shape index: {}]   ;;  %s2130_s14 = inlined_call_operand.vmem [shape: f32[1,32], index: 14, kind: input, shape index: {}]   ;;  %s2131_s15 = inlined_call_operand.vmem [shape: f32[1,32], index: 15, kind: input, shape index: {}]   ;;  %s2132_s16 = inlined_call_operand.vmem [shape: f32[1,32], index: 16, kind: input, shape index: {}]   ;;  %s2133_s17 = inlined_call_operand.hbm [shape: f32[2,8,32], index: 17, kind: output, shape index: {}]  }
   0x1   :  { %2145 = sst [smem:[#allocation22_spill]] %s2116_s0 }
   0x2   :  { %2146 = sst [smem:[#allocation23_spill]] %s2117_s1 }
   0x3   :  { %2147 = sst [smem:[#allocation24_spill]] %s2118_s2 }
   0x4   :  { %2148 = sst [smem:[#allocation25_spill]] %s2123_s7 }
   0x5   :  { %2149 = sst [smem:[#allocation26_spill]] %s2131_s15 }
   0x6   :  { %2150 = sst [smem:[#allocation27_spill]] %s2132_s16 }
   0x7   :  { %2151 = sst [smem:[#allocation28_spill]] %s2133_s17 }
   0x8   :  { %22 = vsyncpa [#allocation5], 0 }
   0x9   :  { %23 = vsyncpa [#allocation8], 0 }
   0xa   :  { %24 = vsyncpa [#allocation6], 0 }
   0xb   :  { %26 = vsyncpa [#allocation6 + $0x1], 0  ;;  %s1865_s24 = smov 0   ;;  %s1867_s25 = smov 0  }
   0xc   :  { %s1869_s26 = smov 0   ;;  %s1871_s27 = smov 0  }
   0xd   :  { %s1873_s28 = smov 0   ;;  %s1875_s29 = smov 0  }
   0xe LB: > { %2152 = sst [smem:[#allocation14_spill]] %s1741_s24  ;;  %s1357_s0 = sadd.s32 4294967295, %s1761_s29   ;;  %s1761_s29 = sphi %s1875_s29, %s32_s29   ;;  %s1757_s28 = sphi %s1873_s28, %s2180_s28   ;;  %s1753_s27 = sphi %s1871_s27, %s2179_s27   ;;  %s1749_s26 = sphi %s1869_s26, %s2178_s26   ;;  %s1745_s25 = sphi %s1867_s25, %s2182_s25   ;;  %s1741_s24 = sphi %s1865_s24, %s2181_s24  }
   0xf   : > { %2153 = sst [smem:[#allocation15_spill]] %s1749_s26  ;;  %s1358_s30 = sadd.s32 4294967294, %s1761_s29  }
  0x10   : > { %2154 = sst [smem:[#allocation16_spill]] %s1757_s28  ;;  %s44_s18 = sadd.s32 1, %s1757_s28 }
  0x11   : > { %2155 = sst [smem:[#allocation17_spill]] %s1761_s29  ;;  %s415_s19 = sadd.s32 1, %s1749_s26 }
  0x12   : > { %p46_p0 = scmp.ge.s32.totalorder %s44_s18, 2  ;;  %p425_p1 = scmp.ne.s32.totalorder %s1749_s26, %s1745_s25 }
  0x13   : > { %p426_p2 = scmp.eq.s32.totalorder %s1357_s0, 1  ;;  %p431_p3 = scmp.ne.s32.totalorder %s1745_s25, %s1741_s24 }
  0x14   : > { %s2184_s18 = smov (%p46_p0, %s44_s18), 0  ;;  %p432_p5 = scmp.eq.s32.totalorder %s1358_s30, 1 }
  0x15   : > { %2156 = sst [smem:[#allocation18_spill]] %s2184_s18  ;;  %p1905_p4 = por %p426_p2, %p425_p1 }
  0x16   : > { %s410_s20 = ssub.s32 %s1757_s28, %s2184_s18  ;;  %p1359_p6 = scmp.ge.s32.totalorder %s1761_s29, 1 }
  0x17   : > { %s2157_s1 = scalar_select %p1905_p4, 1, 0 }
  0x18   : > { %p413_p7 = scmp.eq.s32.totalorder %s410_s20, 0  ;;  %p1912_p8 = por %p432_p5, %p431_p3 }
  0x19   : > { %2158 = sst [smem:[#allocation19_spill]] %s2157_s1  ;;  %p439_p9 = scmp.lt.s32.totalorder %s1761_s29, 3 }
  0x1a   : > { %s2159_s21 = scalar_select %p1912_p8, 1, 0 }
  0x1b   : > { %s1918_s22 = scalar_select %p413_p7, %s1749_s26, %s415_s19  }
  0x1c   : > { %2160 = sst [smem:[#allocation20_spill]] %s2159_s21  ;;  %p1920_p10 = pnand %p1359_p6, %p439_p9 }
  0x1d   : > { %2161 = sst [smem:[#allocation21_spill]] %s1918_s22  ;;  %p1924_p11 = scmp.eq.s32.totalorder %s1357_s0, 0 }
  0x1e   : > { %p1472_p12 = pneg %p1920_p10  ;;  %s2164_s7 = sld [smem:[#allocation25_spill]] }
  0x1f   : > { %s1763_s28 = smov [#allocation7]   ;;  %s1764_s22 = smov 64  }
  0x20   : > { %p1935_p13 = pnand %p1924_p11, %p1472_p12  ;;  %s481_s0 = sshll.u32 %s1763_s28, 4  ;;  %s482_s0 = int_to_ptr.vmem [resolvable:$true] %s481_s0 }
  0x21   : > { %s1765_s26 = smov 4   ;;  %s462_s30 = sshll.u32 %s2121_s5, 4  ;;  %s463_s30 = int_to_ptr.hbm [resolvable:$true] %s462_s30 }
  0x22   : > { %s1766_s20 = smov [#allocation4]   ;;  %s502_s17 = sshll.u32 %s2127_s11, 4  ;;  %s503_s17 = int_to_ptr.hbm [resolvable:$true] %s502_s17 }
  0x23   : > { %s1767_s28 = smov [#allocation9]  }
  0x24   : > { %s479_s18 = sshll.u32 %s2164_s7, 4  ;;  %s464_s7 = sshll.u32 %s1766_s20, 4  ;;  %s480_s18 = int_to_ptr.hbm [resolvable:$true] %s479_s18  ;;  %s465_s7 = int_to_ptr.vmem [resolvable:$true] %s464_s7 }
  0x25   : > { %1478 = dma.hbm_to_vmem [thread:$0]  (!%p1935_p13), %s480_s18, 256, %s482_s0, [#allocation8], %s1764_s22, %s1764_s22, %s1765_s26  }
  0x26   : > { %1475 = dma.hbm_to_vmem [thread:$0]  (!%p1935_p13), %s463_s30, 256, %s465_s7, [#allocation5], %s1764_s22, %s1764_s22, %s1765_s26  }
  0x27   : > { %s504_s15 = sshll.u32 %s1767_s28, 4  ;;  %542 = sbr.rel (%p1920_p10) target bundleno = 1932 (0x78c), region = 88  ;;  %s505_s15 = int_to_ptr.vmem [resolvable:$true] %s504_s15 }
  0x28   : > { %1481 = dma.hbm_to_vmem [thread:$0]  (!%p1935_p13), %s503_s17, 256, %s505_s15, [#allocation8], %s1764_s22, %s1764_s22, %s1765_s26  }
  0x2c   : > { %1728 = dma.done.wait (%p1924_p11), [#allocation5], 256  }
  0x2d   : > { %1730 = vsyncadd (%p1924_p11), [#allocation5], 4294967040 }
  0x2e   : > { %1732 = dma.done.wait (%p1924_p11), [#allocation8], 512  }
  0x2f   : > { %1734 = vsyncadd (%p1924_p11), [#allocation8], 4294966784  ;;  %p604_p0 = scmp.lt.s32.totalorder %s1753_s27, 1  ;;  %s2166_s26 = sld [smem:[#allocation22_spill]]  ;;  %v1445_v0 = vld [vmem:[%s2119_s3 + $0x8] sm:$0xff]  ;;  %v1444_v2 = vld [vmem:[%s2119_s3] sm:$0xff] }
  0x30   : > { %s2167_s23 = sld [smem:[#allocation23_spill]]  ;;  %645 = vmatpush.bf16.msra.mxu0 %v1445_v0  ;;  %vm635_vm0 = vcmask 261120   ;;  %v1553_v6 = vld [vmem:[%s2120_s4] ss:$0 sm:$0xff]  ;;  %vm653_vm1 = vcmask 257024   ;;  %vm734_vm2 = vcmask 64512  }
  0x31   : > { %s605_s7 = scalar_select %p604_p0, %s1753_s27, 1  ;;  %v1447_v22 = vld [vmem:[#allocation4 + $0x8] sm:$0xff]  ;;  %v1446_v23 = vld [vmem:[#allocation4] sm:$0xff]  ;;  %v1555_v37 = vld [vmem:[%s2122_s6] ss:$0 sm:$0xff]  ;;  %vm783_vm3 = vcmask 1043456  }
  0x32   : > { %s2168_s2 = sld [smem:[#allocation24_spill]]  ;;  %s1768_s16 = smov 112   ;;  %681 = vmatpush.bf16.msra.mxu1 %v1447_v22 }
  0x33   : > { %s1369_s15 = sshll.u32 %s605_s7, 3  ;;  %s1769_s17 = smov 120  }
  0x34   : > { %646 = vmatpush.bf16.msra.mxu0 %v1444_v2  ;;  %s1771_s1 = smov 8   ;;  %s1772_s21 = smov 24  }
  0x35   : > { %s607_s29 = scalar_lea.vmem %s2166_s26, %s1369_s15  ;;  %s1770_s26 = smov 104  }
  0x36   : > { %v1449_v1 = vld [vmem:[%s2167_s23 + $0x8] sm:$0xff]  ;;  %v1448_v3 = vld [vmem:[%s2167_s23] sm:$0xff]  ;;  %682 = vmatpush.bf16.msra.mxu1 %v1446_v23  ;;  %s1773_s22 = smov 16   ;;  %s601_s0 = sand.u32 1, %s1745_s25  }
  0x37   : > { %724 = vmatpush.bf16.msra.mxu2 %v1449_v1  ;;  %v1978_v4 = vld [vmem:[%s607_s29] sm:$0xff]  ;;  %s1368_s30 = sshll.u32 %s601_s0, 3  ;;  %s1441_s20 = sshll.u32 %s1753_s27, 3 }
  0x38   : > { %v614_v5 = vpack.c.bf16 %v1978_v4, %v1978_v4  ;;  %v1554_v10 = vld [vmem:[%s2168_s2] ss:$0 sm:$0xff]  ;;  %s2169_s15 = sld [smem:[#allocation26_spill]]  ;;  %s603_s24 = scalar_lea.vmem [#allocation10], %s1368_s30 }
  0x39   : > { %s2173_s19 = sld [smem:[#allocation27_spill]]  ;;  %s1253_s27 = sshll.u32 %s603_s24, 4  ;;  %s1254_s27 = int_to_ptr.vmem [resolvable:$true] %s1253_s27 }
  0x3a   : > { %1378 = vmatmul.msk.bf16.vlgmr.msra.gmra.mxu0 %vm635_vm0, %v614_v5  ;;  %1387 = vmatmul.msk.bf16.vlgmr.msra.gmra.mxu1 %vm635_vm0, %v614_v5  ;;  %s1240_s28 = scalar_lea.sflag [#allocation6], %s601_s0 }
  0x3b   : > { %725 = vmatpush.bf16.msra.mxu2 %v1448_v3 }
  0x3e   : > { %1396 = vmatmul.msk.bf16.vlgmr.msra.gmra.mxu2 %vm635_vm0, %v614_v5 }
  0xb7   : > { %v648_v7 = vpop.f32.mrf.mxu0  ;;  %v684_v38 = vpop.f32.mrf.mxu1 }
  0xb8   : > { %v649_v8 = vadd.f32 %v1553_v6, %v648_v7  ;;  %v685_v39 = vadd.f32 %v1555_v37, %v684_v38 }
  0xba   : > { %v652_v9 = vpack.c.bf16 %v649_v8, %v649_v8  ;;  %v688_v40 = vpack.c.bf16 %v685_v39, %v685_v39 }
  0xbc   : > { %654 = vst.msk [vmem:[#allocation2] sm:$0xf] %vm653_vm1, %v652_v9 }
  0xbd   : > { %689 = vst.msk [vmem:[#allocation3] sm:$0xf] %vm653_vm1, %v688_v40 }
  0xbf   : > { %v650_v13 = vpop.f32.mrf.mxu0  ;;  %v686_v41 = vpop.f32.mrf.mxu1 }
  0xc1   : > { %v727_v11 = vpop.f32.mrf.mxu2 }
  0xc2   : > { %v728_v12 = vadd.f32 %v1554_v10, %v727_v11 }
  0xc3   : > { %v732_v16 = vld [vmem:[#allocation2] sm:$0xf] }
  0xc4   : > { %v731_v14 = vpack.c.bf16 %v728_v12, %v728_v12  ;;  %v739_v18 = vsel %vm734_vm2, %v732_v16, 0  ;;  %v806_v19 = vunpack.c.l.b16 %v732_v16  ;;  %v733_v42 = vld [vmem:[#allocation3] sm:$0xf] }
  0xc5   : > { %748 = vmatpush.bf16.xpose.msra.mxu3 %v739_v18  ;;  %v785_v43 = vsel %vm783_vm3, %v733_v42, 0  ;;  %v856_v12 = vunpack.c.l.b16 %v733_v42 }
  0xc6   : > { %v801_v15 = vunpack.c.l.b16 %v731_v14  ;;  %v807_v21 = vpack.c.b16 %v806_v19, %v806_v19  ;;  %794 = vmatpush.bf16.msrb.mxu0 %v785_v43 }
  0xc8   : > { %v802_v17 = vpack.c.b16 %v801_v15, %v801_v15  ;;  %881 = vrot.lane.b32.xlu1 %v807_v21, %s1768_s16  ;;  %808 = vrot.lane.b32.xlu0 %v807_v21, %s1769_s17 }
  0xc9   : > { %v729_v20 = vpop.f32.mrf.mxu2 }
  0xca   : > { %879 = vrot.lane.b32.xlu2 %v802_v17, %s1768_s16 }
  0xcc   : > { %1397 = vmatmul.msk.bf16.vlgmr.msra.gmra.mxu3 %vm734_vm2, %v731_v14 }
  0xd0   : > { %951 = vrot.lane.b32.xlu1 %v807_v21, %s1770_s26  ;;  %803 = vrot.lane.b32.xlu0 %v802_v17, %s1769_s17  ;;  %v857_v21 = vpack.c.b16 %v856_v12, %v856_v12 }
  0xd2   : > { %949 = vrot.lane.b32.xlu2 %v802_v17, %s1770_s26 }
 0x124   : > { %v880_v28 = vpop.permute.xlu2 %879 }
 0x12c   : > { %v950_v34 = vpop.permute.xlu2 %949 }
 0x13a   : > { %v882_v24 = vpop.permute.xlu1 %881  ;;  %v809_v25 = vpop.permute.xlu0 %808 }
 0x13b   : > { %v814_v26 = vsel %vm734_vm2, %v809_v25, 0  ;;  %v887_v27 = vsel %vm734_vm2, %v882_v24, 0 }
 0x13c   : > { %823 = vmatpush.bf16.xpose.msrb.mxu1 %v814_v26  ;;  %896 = vmatpush.bf16.xpose.msrb.mxu3 %v887_v27 }
 0x142   : > { %v952_v29 = vpop.permute.xlu1 %951  ;;  %v804_v30 = vpop.permute.xlu0 %803 }
 0x143   : > { %v957_v31 = vsel %vm734_vm2, %v952_v29, 0  ;;  %1399 = vmatmul.msk.bf16.vlgmr.msrb.gmra.mxu1 %vm734_vm2, %v804_v30  ;;  %1401 = vmatmul.msk.bf16.vlgmr.msrb.gmra.mxu3 %vm734_vm2, %v880_v28 }
 0x144   : > { %966 = vmatpush.bf16.xpose.msra.mxu1 %v957_v31 }
 0x14f   : > { %v750_v32 = vpop.f32.mrf.mxu3 }
 0x150   : > { %v754_v33 = vmul.f32 0.35355338, %v750_v32 }
 0x152   : > { %v755_v35 = vsel %vm734_vm2, %v754_v33, -inf }
 0x153   : > { %1403 = vmatmul.msk.bf16.vlgmr.msra.gmra.mxu1 %vm734_vm2, %v950_v34  ;;  %756 = vmax.xlane.f32.xlu1 %v755_v35 }
 0x157   : > { %v752_v36 = vpop.f32.mrf.mxu3 }
 0x1c0   : > { %v825_v44 = vpop.f32.mrf.mxu1 }
 0x1c1   : > { %v829_v45 = vmul.f32 0.35355338, %v825_v44 }
 0x1c3   : > { %v830_v46 = vsel %vm734_vm2, %v829_v45, -inf }
 0x1c4   : > { %831 = vmax.xlane.f32.xlu0 %v830_v46 }
 0x1c6   : > { %v757_v47 = vpop.xlane.xlu1 %756  ;;  %v898_v48 = vpop.f32.mrf.mxu3 }
 0x1c7   : > { %v758_v49 = vsub.f32 %v754_v33, %v757_v47  ;;  %v902_v58 = vmul.f32 0.35355338, %v898_v48 }
 0x1c8   : > { %v827_v50 = vpop.f32.mrf.mxu1 }
 0x1c9   : > { %v759_v51 = vmul.f32 1.442695, %v758_v49  ;;  %v903_v60 = vsel %vm734_vm2, %v902_v58, -inf }
 0x1cb   : > { %1563 = vpow2.f32 %v759_v51 }
 0x1ce   : > { %v900_v52 = vpop.f32.mrf.mxu3 }
 0x1d0   : > { %v968_v53 = vpop.f32.mrf.mxu1 }
 0x1d1   : > { %v1564_v54 = vpop.eup %1563  ;;  %v972_v55 = vmul.f32 0.35355338, %v968_v53 }
 0x1d2   : > { %v761_v56 = vsel %vm734_vm2, %v1564_v54, 0.0 }
 0x1d3   : > { %762 = vadd.xlane.f32.xlu1 %v761_v56  ;;  %v973_v57 = vsel %vm734_vm2, %v972_v55, -inf }
 0x1d4   : > { %974 = vmax.xlane.f32.xlu2 %v973_v57 }
 0x1d8   : > { %v970_v59 = vpop.f32.mrf.mxu1 }
 0x1dc   : > { %904 = vmax.xlane.f32.xlu2 %v903_v60 }
 0x237   : > { %v832_v61 = vpop.xlane.xlu0 %831 }
 0x238   : > { %v833_v62 = vsub.f32 %v829_v45, %v832_v61 }
 0x23a   : > { %v834_v63 = vmul.f32 1.442695, %v833_v62 }
 0x23c   : > { %1565 = vpow2.f32 %v834_v63 }
 0x242   : > { %v1566_v0 = vpop.eup %1565 }
 0x243   : > { %v836_v1 = vsel %vm734_vm2, %v1566_v0, 0.0 }
 0x244   : > { %837 = vadd.xlane.f32.xlu0 %v836_v1 }
 0x246   : > { %v763_v2 = vpop.xlane.xlu1 %762 }
 0x247   : > { %1567 = vrcp.f32 %v763_v2  ;;  %v975_v3 = vpop.xlane.xlu2 %974  ;;  %v775_v13 = vand.u32 2147483648, %v763_v2  ;;  %v773_v16 = vand.u32 2147483647, %v763_v2  ;;  %vm769_vm5 = vweird.f32 %v763_v2 }
 0x248   : > { %v976_v5 = vsub.f32 %v972_v55, %v975_v3 }
 0x249   : > { %v776_v20 = vor.u32 1.1754944e-38, %v775_v13  ;;  %vm774_vm7 = vcmp.eq.f32.partialorder %v773_v16, 8.507059e+37 }
 0x24a   : > { %v977_v6 = vmul.f32 1.442695, %v976_v5 }
 0x24c   : > { %1569 = vpow2.f32 %v977_v6 }
 0x24d   : > { %v1568_v7 = vpop.eup %1567 }
 0x24e   : > { %v765_v8 = vmul.f32 %v1568_v7, %v763_v2  ;;  %vm770_vm4 = vweird.f32 %v1568_v7 }
 0x24f   : > { %v905_v9 = vpop.xlane.xlu2 %904  ;;  %vm771_vm6 = vmor %vm769_vm5, %vm770_vm4 }
 0x250   : > { %v766_v10 = vsub.f32 1.0, %v765_v8  ;;  %v906_v11 = vsub.f32 %v902_v58, %v905_v9 }
 0x252   : > { %v2017_v14 = vpop.eup %1569  ;;  %v767_v15 = vmul.f32 %v1568_v7, %v766_v10  ;;  %v907_v17 = vmul.f32 1.442695, %v906_v11 }
 0x253   : > { %v979_v18 = vsel %vm734_vm2, %v2017_v14, 0.0 }
 0x254   : > { %v768_v19 = vadd.f32 %v1568_v7, %v767_v15  ;;  %1571 = vpow2.f32 %v907_v17  ;;  %980 = vadd.xlane.f32.xlu2 %v979_v18  ;;  %v1451_v18 = vld [vmem:[#allocation7 + $0x8] sm:$0xff] }
 0x255   : > { %1066 = vmatpush.bf16.msra.mxu3 %v1451_v18 }
 0x256   : > { %v772_v22 = vsel %vm771_vm6, %v1568_v7, %v768_v19  ;;  %v1450_v19 = vld [vmem:[#allocation7] sm:$0xff] }
 0x257   : > { %v777_v23 = vsel %vm774_vm7, %v776_v20, %v772_v22  ;;  %vm1034_vm7 = vcmask 195584  }
 0x258   : > { %858 = vrot.lane.b32.xlu0 %v857_v21, %s1769_s17  ;;  %v778_v24 = vmul.f32 %v1564_v54, %v777_v23 }
 0x259   : > { %1067 = vmatpush.bf16.msra.mxu3 %v1450_v19 }
 0x25a   : > { %v2022_v25 = vpop.eup %1571  ;;  %v779_v26 = vpack.c.bf16 %v778_v24, %v778_v24 }
 0x25b   : > { %v909_v27 = vsel %vm734_vm2, %v2022_v25, 0.0 }
 0x25c   : > { %1398 = vmatmul.msk.bf16.vlgmr.msrb.gmra.mxu0 %vm734_vm2, %v779_v26  ;;  %910 = vadd.xlane.f32.xlu1 %v909_v27  ;;  %v1556_v27 = vld [vmem:[%s2124_s8] ss:$0 sm:$0xff] }
 0x26c   : > { %998 = vrot.lane.b32.xlu2 %v857_v21, %s1770_s26  ;;  %s2170_s26 = sld [smem:[#allocation28_spill]] }
 0x272   : > { %s2171_s18 = smov %s2170_s26  ;;  %s1251_s29 = scalar_lea.hbm %s2170_s26, %s1441_s20 }
 0x273   : > { %s1255_s2 = sshll.u32 %s1251_s29, 4  ;;  %s1695_s30 = scalar_lea.hbm %s2171_s18, 16  ;;  %s1256_s2 = int_to_ptr.hbm [resolvable:$true] %s1255_s2 }
 0x274   : > { %s1689_s7 = sshra.s32 %s1256_s2, 4  ;;  %s1690_s7 = int_to_ptr.hbm [resolvable:$true] %s1689_s7 }
 0x275   : > { %928 = vrot.lane.b32.xlu1 %v857_v21, %s1768_s16  ;;  %s1691_s20 = scalar_lea.hbm %s1690_s7, 8  ;;  %p1696_p5 = scmp.lt.s32.totalorder %s1690_s7, %s2171_s18 }
 0x276   : > { %p1692_p1 = scmp.ne.s32.totalorder %s1690_s7, %s1691_s20  ;;  %p1697_p6 = scmp.lt.s32.totalorder %s1695_s30, %s1691_s20 }
 0x278   : > { %p1693_p2 = pnand %p1692_p1, %p1905_p4  ;;  %p1698_p7 = por %p1697_p6, %p1696_p5 }
 0x27a   : > { %p1694_p3 = pneg %p1693_p2 }
 0x27c   : > { %p1699_p9 = pnand %p1698_p7, %p1694_p3 }
 0x2b7   : > { %v838_v28 = vpop.xlane.xlu0 %837 }
 0x2b8   : > { %1573 = vrcp.f32 %v838_v28  ;;  %v850_v33 = vand.u32 2147483648, %v838_v28  ;;  %v848_v34 = vand.u32 2147483647, %v838_v28  ;;  %vm844_vm9 = vweird.f32 %v838_v28 }
 0x2ba   : > { %v851_v36 = vor.u32 1.1754944e-38, %v850_v33  ;;  %vm849_vm11 = vcmp.eq.f32.partialorder %v848_v34, 8.507059e+37  ;;  %v1774_v33 = vmov 32.0  }
 0x2be   : > { %v1574_v29 = vpop.eup %1573 }
 0x2bf   : > { %v840_v30 = vmul.f32 %v1574_v29, %v838_v28  ;;  %vm845_vm8 = vweird.f32 %v1574_v29 }
 0x2c0   : > { %vm846_vm10 = vmor %vm844_vm9, %vm845_vm8 }
 0x2c1   : > { %v841_v31 = vsub.f32 1.0, %v840_v30 }
 0x2c3   : > { %v842_v32 = vmul.f32 %v1574_v29, %v841_v31 }
 0x2c5   : > { %v843_v35 = vadd.f32 %v1574_v29, %v842_v32 }
 0x2c7   : > { %v981_v37 = vpop.xlane.xlu2 %980  ;;  %v847_v38 = vsel %vm846_vm10, %v1574_v29, %v843_v35 }
 0x2c8   : > { %1575 = vrcp.f32 %v981_v37  ;;  %v852_v39 = vsel %vm849_vm11, %v851_v36, %v847_v38  ;;  %v993_v50 = vand.u32 2147483648, %v981_v37  ;;  %v991_v52 = vand.u32 2147483647, %v981_v37 }
 0x2c9   : > { %v853_v41 = vmul.f32 %v1566_v0, %v852_v39  ;;  %vm987_vm13 = vweird.f32 %v981_v37  ;;  %vm1188_vm11 = vcmask 523264  }
 0x2ca   : > { %v859_v40 = vpop.permute.xlu0 %858  ;;  %v994_v55 = vor.u32 1.1754944e-38, %v993_v50  ;;  %vm992_vm15 = vcmp.eq.f32.partialorder %v991_v52, 8.507059e+37 }
 0x2cb   : > { %v864_v42 = vsel %vm783_vm3, %v859_v40, 0  ;;  %v854_v43 = vpack.c.bf16 %v853_v41, %v853_v41 }
 0x2cc   : > { %873 = vmatpush.bf16.msrb.mxu2 %v864_v42 }
 0x2ce   : > { %v1576_v44 = vpop.eup %1575 }
 0x2cf   : > { %v983_v45 = vmul.f32 %v1576_v44, %v981_v37  ;;  %1400 = vmatmul.msk.bf16.vlgmr.msrb.gmra.mxu2 %vm734_vm2, %v854_v43  ;;  %v911_v46 = vpop.xlane.xlu1 %910  ;;  %v999_v47 = vpop.permute.xlu2 %998  ;;  %vm988_vm12 = vweird.f32 %v1576_v44 }
 0x2d0   : > { %1577 = vrcp.f32 %v911_v46  ;;  %v1004_v49 = vsel %vm783_vm3, %v999_v47, 0  ;;  %vm989_vm14 = vmor %vm987_vm13, %vm988_vm12  ;;  %v923_v0 = vand.u32 2147483648, %v911_v46  ;;  %vm917_vm4 = vweird.f32 %v911_v46 }
 0x2d1   : > { %v984_v48 = vsub.f32 1.0, %v983_v45  ;;  %1013 = vmatpush.bf16.msra.mxu2 %v1004_v49  ;;  %v921_v2 = vand.u32 2147483647, %v911_v46  ;;  %1579 = vrcp.f32 %v1774_v33  ;;  %v1452_v45 = vld [vmem:[#allocation9] sm:$0xff]  ;;  %v1456_v49 = vld [vmem:[%s2129_s13 + $0x10] sm:$0xff] }
 0x2d2   : > { %v924_v5 = vor.u32 1.1754944e-38, %v923_v0  ;;  %v1455_v0 = vld [vmem:[%s2129_s13 + $0x8] sm:$0xff] }
 0x2d3   : > { %v985_v51 = vmul.f32 %v1576_v44, %v984_v48  ;;  %vm922_vm6 = vcmp.eq.f32.partialorder %v921_v2, 8.507059e+37  ;;  %v1559_v2 = vld [vmem:[%s2128_s12] ss:$0 sm:$0xff] }
 0x2d5   : > { %v986_v53 = vadd.f32 %v1576_v44, %v985_v51 }
 0x2d6   : > { %v1578_v54 = vpop.eup %1577 }
 0x2d7   : > { %v990_v56 = vsel %vm989_vm14, %v1576_v44, %v986_v53  ;;  %v913_v57 = vmul.f32 %v1578_v54, %v911_v46  ;;  %vm918_vm1 = vweird.f32 %v1578_v54  ;;  %v1580_v34 = vpop.eup %1579  ;;  %v1457_v46 = vld [vmem:[%s2129_s13 + $0x18] sm:$0xff] }
 0x2d8   : > { %v995_v58 = vsel %vm992_vm15, %v994_v55, %v990_v56  ;;  %vm919_vm5 = vmor %vm917_vm4, %vm918_vm1  ;;  %v1080_v35 = vmul.f32 32.0, %v1580_v34  ;;  %1196 = vmatpush.bf16.msrb.mxu1 %v1457_v46 }
 0x2d9   : > { %v996_v59 = vmul.f32 %v2017_v14, %v995_v58  ;;  %v914_v60 = vsub.f32 1.0, %v913_v57  ;;  %v796_v61 = vpop.f32.mrf.mxu0  ;;  %v1557_v57 = vld [vmem:[%s2125_s9] ss:$0 sm:$0xff] }
 0x2da   : > { %v1081_v36 = vsub.f32 1.0, %v1080_v35 }
 0x2db   : > { %v915_v62 = vmul.f32 %v1578_v54, %v914_v60  ;;  %v997_v1 = vpack.c.bf16 %v996_v59, %v996_v59  ;;  %v1558_v59 = vld [vmem:[%s2126_s10] ss:$0 sm:$0xff] }
 0x2dc   : > { %v1082_v37 = vmul.f32 %v1580_v34, %v1081_v36  ;;  %1197 = vmatpush.bf16.msrb.mxu1 %v1456_v49 }
 0x2dd   : > { %v916_v63 = vadd.f32 %v1578_v54, %v915_v62 }
 0x2de   : > { %v1083_v38 = vadd.f32 %v1580_v34, %v1082_v37 }
 0x2df   : > { %1404 = vmatmul.msk.bf16.vlgmr.msra.gmra.mxu2 %vm734_vm2, %v997_v1  ;;  %v920_v3 = vsel %vm919_vm5, %v1578_v54, %v916_v63  ;;  %v1454_v1 = vld [vmem:[%s2129_s13] sm:$0xff] }
 0x2e0   : > { %v925_v7 = vsel %vm922_vm6, %v924_v5, %v920_v3  ;;  %1198 = vmatpush.bf16.msrb.mxu1 %v1455_v0 }
 0x2e1   : > { %v798_v6 = vpop.f32.mrf.mxu0  ;;  %v926_v8 = vmul.f32 %v2022_v25, %v925_v7 }
 0x2e3   : > { %v927_v11 = vpack.c.bf16 %v926_v8, %v926_v8 }
 0x2e4   : > { %1199 = vmatpush.bf16.msrb.mxu1 %v1454_v1 }
 0x2e7   : > { %v929_v9 = vpop.permute.xlu1 %928 }
 0x2e8   : > { %v934_v10 = vsel %vm783_vm3, %v929_v9, 0  ;;  %vm1032_vm3 = vcmask 130048   ;;  %v1560_v9 = vld [vmem:[%s2130_s14] ss:$0 sm:$0xff] }
 0x2e9   : > { %943 = vmatpush.bf16.msra.mxu0 %v934_v10 }
 0x2ec   : > { %1402 = vmatmul.msk.bf16.vlgmr.msra.gmra.mxu0 %vm734_vm2, %v927_v11 }
 0x352   : > { %v875_v12 = vpop.f32.mrf.mxu2 }
 0x353   : > { %1020 = vrot.lane.b32.xlu0 %v875_v12, %s1771_s1 }
 0x35a   : > { %v877_v13 = vpop.f32.mrf.mxu2 }
 0x362   : > { %v1015_v14 = vpop.f32.mrf.mxu2 }
 0x363   : > { %1028 = vrot.lane.b32.xlu2 %v1015_v14, %s1772_s21 }
 0x369   : > { %v945_v15 = vpop.f32.mrf.mxu0 }
 0x36a   : > { %1024 = vrot.lane.b32.xlu0 %v945_v15, %s1773_s22  ;;  %v1017_v16 = vpop.f32.mrf.mxu2 }
 0x371   : > { %v947_v17 = vpop.f32.mrf.mxu0 }
 0x3bd   : > { %v1029_v23 = vpop.permute.xlu2 %1028 }
 0x3c5   : > { %v1021_v20 = vpop.permute.xlu0 %1020 }
 0x3c6   : > { %v1031_v21 = vsel %vm734_vm2, %v796_v61, %v1021_v20  ;;  %vm1084_vm2 = vweird.f32 %v1580_v34 }
 0x3c7   : > { %v1085_v39 = vsel %vm1084_vm2, %v1580_v34, %v1083_v38 }
 0x3dc   : > { %v1025_v22 = vpop.permute.xlu0 %1024 }
 0x3dd   : > { %v1033_v24 = vsel %vm1032_vm3, %v1031_v21, %v1025_v22 }
 0x3de   : > { %v1035_v25 = vsel %vm1034_vm7, %v1033_v24, %v1029_v23 }
 0x3df   : > { %v1036_v26 = vpack.c.bf16 %v1035_v25, %v1035_v25 }
 0x3e1   : > { %1413 = vmatmul.msk.bf16.vlgmr.msra.gmra.mxu3 %vm635_vm0, %v1036_v26 }
 0x464   : > { %v1069_v28 = vpop.f32.mrf.mxu3 }
 0x465   : > { %v1070_v29 = vadd.f32 %v1556_v27, %v1069_v28 }
 0x467   : > { %v1073_v30 = vadd.f32 %v1070_v29, %v1978_v4  ;;  %v1453_v4 = vld [vmem:[#allocation9 + $0x8] sm:$0xff]  ;;  %v1561_v29 = vld [vmem:[%s2169_s15] ss:$0 sm:$0xff] }
 0x468   : > { %1143 = vmatpush.bf16.msrb.mxu0 %v1453_v4 }
 0x469   : > { %v1076_v31 = vsel %vm635_vm0, %v1073_v30, 0.0 }
 0x46a   : > { %1077 = vadd.xlane.f32.xlu1 %v1076_v31 }
 0x46c   : > { %v1071_v32 = vpop.f32.mrf.mxu3  ;;  %1144 = vmatpush.bf16.msrb.mxu0 %v1452_v45 }
 0x46d   : > { %v1562_v32 = vld [vmem:[%s2173_s19] ss:$0 sm:$0xff] }
 0x4dd   : > { %v1078_v40 = vpop.xlane.xlu1 %1077 }
 0x4de   : > { %v1086_v41 = vmul.f32 %v1085_v39, %v1078_v40 }
 0x4e0   : > { %v1087_v42 = vsub.f32 %v1073_v30, %v1086_v41 }
 0x4e2   : > { %v1088_v43 = vmul.f32 %v1087_v42, %v1087_v42 }
 0x4e4   : > { %v1089_v44 = vsel %vm635_vm0, %v1088_v43, 0.0 }
 0x4e5   : > { %1090 = vadd.xlane.f32.xlu0 %v1089_v44 }
 0x558   : > { %v1091_v47 = vpop.xlane.xlu0 %1090 }
 0x559   : > { %v1092_v48 = vmul.f32 %v1091_v47, %v1085_v39 }
 0x55b   : > { %v1093_v50 = vadd.f32 1e-05, %v1092_v48 }
 0x55d   : > { %1581 = vrsqrt.f32 %v1093_v50  ;;  %vm1100_vm9 = vweird.f32 %v1093_v50 }
 0x563   : > { %v1582_v51 = vpop.eup %1581 }
 0x564   : > { %v1095_v52 = vmul.f32 %v1582_v51, %v1093_v50  ;;  %vm1101_vm8 = vweird.f32 %v1582_v51 }
 0x565   : > { %vm1102_vm10 = vmor %vm1100_vm9, %vm1101_vm8 }
 0x566   : > { %v1096_v53 = vmul.f32 %v1582_v51, %v1095_v52 }
 0x568   : > { %v1097_v54 = vmul.f32 0.5, %v1096_v53 }
 0x56a   : > { %v1098_v55 = vsub.f32 1.5, %v1097_v54 }
 0x56c   : > { %v1099_v56 = vmul.f32 %v1582_v51, %v1098_v55 }
 0x56e   : > { %v1103_v58 = vsel %vm1102_vm10, %v1582_v51, %v1099_v56 }
 0x56f   : > { %v1104_v60 = vmul.f32 %v1103_v58, %v1087_v42 }
 0x571   : > { %v1108_v61 = vmul.f32 %v1557_v57, %v1104_v60 }
 0x573   : > { %v1112_v62 = vadd.f32 %v1558_v59, %v1108_v61 }
 0x575   : > { %v1113_v63 = vpack.c.bf16 %v1112_v62, %v1112_v62 }
 0x577   : > { %1422 = vmatmul.msk.bf16.vlgmr.msrb.gmra.mxu0 %vm635_vm0, %v1113_v63 }
 0x5f4   : > { %v1146_v3 = vpop.f32.mrf.mxu0 }
 0x5f5   : > { %v1147_v5 = vadd.f32 %v1559_v2, %v1146_v3 }
 0x5f7   : > { %v1150_v6 = vmax.f32 %v1147_v5, 0.0 }
 0x5f9   : > { %v1151_v7 = vpack.c.bf16 %v1150_v6, %v1150_v6 }
 0x5fb   : > { %1439 = vmatmul.msk.bf16.vlgmr.msrb.gmra.mxu1 %vm1188_vm11, %v1151_v7 }
 0x5fc   : > { %v1148_v8 = vpop.f32.mrf.mxu0 }
 0x678   : > { %v1201_v10 = vpop.f32.mrf.mxu1 }
 0x679   : > { %v1202_v11 = vadd.f32 %v1560_v9, %v1201_v10 }
 0x67b   : > { %v1205_v12 = vadd.f32 %v1202_v11, %v1112_v62 }
 0x67d   : > { %v1208_v13 = vsel %vm635_vm0, %v1205_v12, 0.0 }
 0x67e   : > { %1209 = vadd.xlane.f32.xlu2 %v1208_v13 }
 0x680   : > { %v1203_v14 = vpop.f32.mrf.mxu1 }
 0x6f1   : > { %v1210_v15 = vpop.xlane.xlu2 %1209 }
 0x6f2   : > { %v1211_v16 = vmul.f32 %v1210_v15, %v1085_v39 }
 0x6f4   : > { %v1212_v17 = vsub.f32 %v1205_v12, %v1211_v16 }
 0x6f6   : > { %v1213_v18 = vmul.f32 %v1212_v17, %v1212_v17 }
 0x6f8   : > { %v1214_v19 = vsel %vm635_vm0, %v1213_v18, 0.0 }
 0x6f9   : > { %1215 = vadd.xlane.f32.xlu1 %v1214_v19 }
 0x76c   : > { %v1216_v20 = vpop.xlane.xlu1 %1215 }
 0x76d   : > { %v1217_v21 = vmul.f32 %v1216_v20, %v1085_v39 }
 0x76f   : > { %v1218_v22 = vadd.f32 1e-05, %v1217_v21 }
 0x771   : > { %1583 = vrsqrt.f32 %v1218_v22  ;;  %vm1225_vm13 = vweird.f32 %v1218_v22 }
 0x777   : > { %v1584_v23 = vpop.eup %1583 }
 0x778   : > { %v1220_v24 = vmul.f32 %v1584_v23, %v1218_v22  ;;  %vm1226_vm12 = vweird.f32 %v1584_v23 }
 0x779   : > { %vm1227_vm14 = vmor %vm1225_vm13, %vm1226_vm12 }
 0x77a   : > { %v1221_v25 = vmul.f32 %v1584_v23, %v1220_v24 }
 0x77c   : > { %v1222_v26 = vmul.f32 0.5, %v1221_v25 }
 0x77e   : > { %v1223_v27 = vsub.f32 1.5, %v1222_v26 }
 0x780   : > { %v1224_v28 = vmul.f32 %v1584_v23, %v1223_v27 }
 0x782   : > { %v1228_v30 = vsel %vm1227_vm14, %v1584_v23, %v1224_v28 }
 0x783   : > { %v1229_v31 = vmul.f32 %v1228_v30, %v1212_v17 }
 0x785   : > { %v1233_v33 = vmul.f32 %v1561_v29, %v1229_v31 }
 0x787   : > { %v1237_v34 = vadd.f32 %v1562_v32, %v1233_v33 }
 0x789   : > { %1238 = vst.msk [vmem:[%s603_s24] sm:$0xff] %vm635_vm0, %v1237_v34 }
 0x78a   : > { %1702 = shalt.err (!%p1699_p9)
}
 0x78b   : > { %1470 = dma.vmem_to_hbm [thread:$0]  (%p1905_p4), %s1254_s27, 128, %s1256_s2, %s1240_s28  }
 0x78c PF: > { %s2174_s0 = sld [smem:[#allocation17_spill]] }
 0x78d   : > { %s2175_s29 = sld [smem:[#allocation14_spill]] }
 0x792   : > { %p1492_p10 = scmp.ge.s32.totalorder %s2174_s0, 2 }
 0x793   : > { %s1267_s22 = sand.u32 1, %s2175_s29  }
 0x794   : > { %p1483_p11 = pnand %p1492_p10, %p1912_p8  ;;  %s1268_s19 = scalar_lea.sflag [#allocation6], %s1267_s22 }
 0x796   : > { %p1484_p12 = pneg %p1483_p11 }
 0x798   : > { %1736 = dma.done.wait (%p1484_p12), %s1268_s19, 128  }
 0x799   : > { %1738 = vsyncadd (%p1484_p12), %s1268_s19, 4294967168  ;;  %s32_s29 = sadd.s32 1, %s2174_s0   ;;  %s2177_s7 = sld [smem:[#allocation15_spill]] }
 0x79a   : > { %p29_p13 = scmp.ge.s32.totalorder %s32_s29, 4   ;;  %s2178_s26 = sld [smem:[#allocation21_spill]] }
 0x79b   : > { %s2179_s27 = sld [smem:[#allocation16_spill]]  ;;  %s2181_s24 = smov %s1745_s25 }
 0x79c   : > { %s2180_s28 = sld [smem:[#allocation18_spill]]  ;;  %31 = sbr.rel (!%p29_p13) target bundleno = 14 (0xe), region = 141 }
 0x79f   : > { %s2182_s25 = smov %s2177_s7 }
 0x7a1   :  { %1274 = vsyncpa [#allocation5], 1 }
 0x7a2   :  { %1276 = vsyncpa [#allocation5 + $0x1], 1 }
 0x7a3   :  { %1277 = vsyncpa [#allocation8], 1 }
 0x7a4   :  { %1278 = vsyncpa [#allocation6], 1 }
 0x7a5   :  { %1280 = vsyncpa [#allocation6 + $0x1], 1 }

</bundles_post_ra>
